<compile_context>
chip_gen: v7x
topology: tpu7x:2x2x1
jax: 0.10.0
libtpu: 0.0.40
codegen_flags: <defaults>
</compile_context>

<pallas_src>
import functools
import math

import jax
import jax.numpy as jnp
from jax.experimental import pallas as pl
from jax.experimental.pallas import tpu as pltpu

_INV_SQRT2 = 0.7071067811865476


# ----------------------------- small helpers --------------------------------

def _round_up(x, m):
    return ((x + m - 1) // m) * m


def _prod(shape):
    return int(math.prod(shape))


def _gelu_exact(x):
    # Matches torch.nn.GELU() default (erf formulation).
    return 0.5 * x * (1.0 + jax.lax.erf(x * _INV_SQRT2))


def _group_onehots(cpg, g):
    """(dout, g) gather one-hot and (g, dout) broadcast one-hot, both straight
    from iotas so neither needs an XLU transpose."""
    dout = cpg * g
    d = jax.lax.broadcasted_iota(jnp.int32, (dout, g), 0)
    gi = jax.lax.broadcasted_iota(jnp.int32, (dout, g), 1)
    gmat = ((d >= gi * cpg) & (d < (gi + 1) * cpg)).astype(jnp.float32)
    dt = jax.lax.broadcasted_iota(jnp.int32, (g, dout), 1)
    gt = jax.lax.broadcasted_iota(jnp.int32, (g, dout), 0)
    gmat_t = ((dt >= gt * cpg) & (dt < (gt + 1) * cpg)).astype(jnp.float32)
    return gmat, gmat_t


def _group_norm(h, gmat, gmat_t, cpg, gamma, beta, eps):
    """GroupNorm over (M, dout) with dout = g*cpg channels, per row.

    Centered two-pass variance (no E[x^2]-mean^2 cancellation); rsqrt is taken
    on the tiny (M, g) stats before broadcasting back with a plain jnp.dot.
    """
    inv_cpg = 1.0 / float(cpg)
    mean = jnp.dot(h, gmat, preferred_element_type=jnp.float32) * inv_cpg       # (M, g)
    mean_f = jnp.dot(mean, gmat_t, preferred_element_type=jnp.float32)          # (M, dout)
    c = h - mean_f
    var = jnp.dot(c * c, gmat, preferred_element_type=jnp.float32) * inv_cpg    # (M, g)
    inv_std = jax.lax.rsqrt(var + eps)                                          # tiny EUP work
    inv_std_f = jnp.dot(inv_std, gmat_t, preferred_element_type=jnp.float32)    # (M, dout)
    return c * inv_std_f * gamma + beta


# ----------------------------- fused Pallas kernel ---------------------------

def fused_task_encoder_kernel(*refs, stage_meta, eps, n_sig, n_one):
    """Entire TaskEncoder forward for one (bm, Din) row-block.

    refs = (x, [w, b, gn_w, gn_b] per encoder stage, w_heads, b_heads, out)
    stage_meta: tuple of (channels_per_group, num_groups) per stage (static).
    Columns [0:n_one]   -> 1 + sigmoid   (gamma_0, sum_from=1)
            [n_one:n_sig] -> sigmoid     (beta_0,  sum_from=0)
            [n_sig:total] -> erf-GELU    (all other heads)
    """
    x_ref = refs[0]
    out_ref = refs[-1]
    wh_ref, bh_ref = refs[-3], refs[-2]

    h = x_ref[...].astype(jnp.float32)                                   # (bm, Din)

    onehot_cache = {}                                                    # hoisted across stages
    idx = 1
    for (cpg, g) in stage_meta:
        w_ref, b_ref, gw_ref, gb_ref = refs[idx:idx + 4]
        idx += 4
        w = w_ref[...]                                                   # bf16 (or f32)
        # Feed the MXU in the weight dtype (single-pass bf16 matmul, f32 acc).
        h = jnp.dot(h.astype(w.dtype), w,
                    preferred_element_type=jnp.float32) + b_ref[...]
        h = _gelu_exact(h)
        key = (cpg, g)
        if key not in onehot_cache:
            onehot_cache[key] = _group_onehots(cpg, g)
        gmat, gmat_t = onehot_cache[key]
        h = _group_norm(h, gmat, gmat_t, cpg, gw_ref[...], gb_ref[...], eps)
        # Dropout: inference-mode identity.

    # One lane-dense matmul for every head at once: (bm, E) @ (E, total).
    wh = wh_ref[...]
    y = jnp.dot(h.astype(wh.dtype), wh,
                preferred_element_type=jnp.float32) + bh_ref[...]

    total = y.shape[1]
    # Static, lane-aligned slices (n_one / n_sig are multiples of 128 here).
    if n_one > 0:
        out_ref[:, :n_one] = 1.0 + jax.nn.sigmoid(y[:, :n_one])
    if n_sig > n_one:
        out_ref[:, n_one:n_sig] = jax.nn.sigmoid(y[:, n_one:n_sig])
    if total > n_sig:
        out_ref[:, n_sig:] = _gelu_exact(y[:, n_sig:])


def fused_task_encoder(params, x_rows, *, block_m=128):
    """Run the fused kernel on (M, input_size) rows; returns (M, total) f32."""
    stages = params["stages"]
    layout = params["head_layout"]
    total = layout["total"]
    stage_meta = tuple((s["cpg"], s["g"]) for s in stages)

    M, din = x_rows.shape
    bm = _round_up(min(block_m, _round_up(max(M, 8), 8)), 8)
    mp = _round_up(max(M, bm), bm)
    if mp != M:
        x_rows = jnp.pad(x_rows, ((0, mp - M), (0, 0)))
    grid = (mp // bm,)

    kern = functools.partial(
        fused_task_encoder_kernel,
        stage_meta=stage_meta, eps=params["eps"],
        n_sig=layout["n_sig"], n_one=layout["n_one"])

    args = [x_rows]
    for s in stages:
        args += [s["w"], s["b"], s["gn_w"], s["gn_b"]]
    args += [params["w_heads"], params["b_heads"]]

    def _resident(arr):
        # Whole array VMEM-resident; constant block index across the M grid
        # so the weights are DMA'd once and reused by every row block.
        return pl.BlockSpec(arr.shape, lambda i, _n=arr.ndim: (0,) * _n)

    in_specs = [pl.BlockSpec((bm, din), lambda i: (i, 0))]
    in_specs += [_resident(a) for a in args[1:]]
    out_specs = pl.BlockSpec((bm, total), lambda i: (i, 0))

    # Cost estimate (helps XLA schedule the custom call against neighbors).
    flops_per_row = 0
    trans_per_row = 0
    for s in stages:
        di, do = s["w"].shape
        flops_per_row += 2 * di * do + 3 * 2 * do * s["g"]
        trans_per_row += do + s["g"]
    e_last, _ = params["w_heads"].shape
    flops_per_row += 2 * e_last * total
    trans_per_row += total
    weight_bytes = sum(int(a.size) * a.dtype.itemsize for a in args[1:])
    ce = pl.CostEstimate(
        flops=int(mp * flops_per_row),
        transcendentals=int(mp * trans_per_row),
        bytes_accessed=int(weight_bytes + mp * (din + total) * 4))

    out = pl.pallas_call(
        kern,
        out_shape=jax.ShapeDtypeStruct((mp, total), jnp.float32),
        grid=grid,
        in_specs=in_specs,
        out_specs=out_specs,
        compiler_params=pltpu.CompilerParams(
            dimension_semantics=("parallel",)),
        cost_estimate=ce,
    )(*args)
    return out[:M]


# ----------------------------- parameter setup -------------------------------

def _linear_params(key, fan_in, fan_out):
    # PyTorch nn.Linear default init: U(-1/sqrt(fan_in), 1/sqrt(fan_in)).
    kw, kb = jax.random.split(key)
    bound = 1.0 / math.sqrt(fan_in)
    w = jax.random.uniform(kw, (fan_in, fan_out), jnp.float32, -bound, bound)
    b = jax.random.uniform(kb, (1, fan_out), jnp.float32, -bound, bound)
    return w, b


def init_task_encoder_params(key, input_size, encoder_vector_sizes,
                             raw_input_shape, hidden_vector_shapes,
                             num_channels_per_group, eps=1e-5,
                             weight_dtype=jnp.bfloat16):
    # weight_dtype=bfloat16 halves weight DMA and gives single-pass MXU matmuls
    # (activations downcast to bf16 at the dot; accumulation in f32).  Use
    # jnp.float32 if exact PyTorch-f32 parity is required (precision trade-off).
    if isinstance(num_channels_per_group, int):
        num_channels_per_group = [num_channels_per_group] * len(encoder_vector_sizes)

    n_stage = len(encoder_vector_sizes)
    n_heads = len(hidden_vector_shapes) + 1
    keys = jax.random.split(key, n_stage + 2 * n_heads)
    k_iter = iter(keys)

    # initial_encoder stages: Linear -> GELU -> GroupNorm -> Dropout(identity)
    stages = []
    for i, dout in enumerate(encoder_vector_sizes):
        din = input_size if i == 0 else encoder_vector_sizes[i - 1]
        cpg = int(num_channels_per_group[i])
        assert dout % cpg == 0
        w, b = _linear_params(next(k_iter), din, dout)
        stages.append(dict(w=w.astype(weight_dtype), b=b,
                           gn_w=jnp.ones((1, dout), jnp.float32),
                           gn_b=jnp.zeros((1, dout), jnp.float32),
                           cpg=cpg, g=int(dout // cpg)))

    # Heads: all LinearNd weights concatenated along the output dim.
    e_last = encoder_vector_sizes[-1]
    head_shapes = [tuple(raw_input_shape)] + [tuple(s) for s in hidden_vector_shapes]
    gamma_wb, beta_wb = [], []
    for shp in head_shapes:
        gamma_wb.append(_linear_params(next(k_iter), e_last, _prod(shp)))
        beta_wb.append(_linear_params(next(k_iter), e_last, _prod(shp)))

    # Concat order: [gamma_0, beta_0, gamma_1..K, beta_1..K] so the sigmoid
    # (sum_from) region is a single lane-aligned prefix of the output row.
    blocks_w, blocks_b = [], []
    gamma_descs = [None] * n_heads
    beta_descs = [None] * n_heads
    offset = 0

    def _append(which, i):
        nonlocal offset
        w, b = (gamma_wb if which == "gamma" else beta_wb)[i]
        blocks_w.append(w)
        blocks_b.append(b)
        size = int(w.shape[1])
        desc = (offset, size, head_shapes[i])
        if which == "gamma":
            gamma_descs[i] = desc
        else:
            beta_descs[i] = desc
        offset += size

    _append("gamma", 0)
    _append("beta", 0)
    for i in range(1, n_heads):
        _append("gamma", i)
    for i in range(1, n_heads):
        _append("beta", i)

    p0 = _prod(head_shapes[0])
    head_layout = dict(total=offset, n_sig=2 * p0, n_one=p0,
                       gamma=gamma_descs, beta=beta_descs)

    w_heads = jnp.concatenate(blocks_w, axis=1).astype(weight_dtype)  # (E, total)
    b_heads = jnp.concatenate(blocks_b, axis=1)                       # (1, total)

    return dict(stages=stages, w_heads=w_heads, b_heads=b_heads,
                head_layout=head_layout, eps=float(eps))


# ----------------------------- forward pass ----------------------------------

def task_encoder_forward(params, x):
    """x: (input_size,) float32. Returns (gamma_outputs, beta_outputs)."""
    x_row = x.reshape(1, -1).astype(jnp.float32)          # unsqueeze(0)
    y = fused_task_encoder(params, x_row)[0]              # (total,)

    def _split(desc):
        start, size, shp = desc
        v = y[start:start + size]
        return v.reshape(shp) if len(shp) > 1 else v      # LinearNd reshape rule

    gamma_outputs = [_split(d) for d in params["head_layout"]["gamma"]]
    beta_outputs = [_split(d) for d in params["head_layout"]["beta"]]
    return gamma_outputs, beta_outputs


# ----------------------------- pure-JAX reference -----------------------------

def reference_forward_rows(params, x_rows):
    """Plain-jnp forward mirroring the kernel math (incl. bf16 operand casts)."""
    h = x_rows.astype(jnp.float32)
    for s in params["stages"]:
        w = s["w"]
        h = jnp.dot(h.astype(w.dtype), w,
                    preferred_element_type=jnp.float32) + s["b"]
        h = _gelu_exact(h)
        m, dout = h.shape
        hg = h.reshape(m, s["g"], s["cpg"])
        mean = hg.mean(axis=2, keepdims=True)
        var = ((hg - mean) ** 2).mean(axis=2, keepdims=True)
        hg = (hg - mean) * jax.lax.rsqrt(var + params["eps"])
        h = hg.reshape(m, dout) * s["gn_w"] + s["gn_b"]
    wh = params["w_heads"]
    y = jnp.dot(h.astype(wh.dtype), wh,
                preferred_element_type=jnp.float32) + params["b_heads"]
    layout = params["head_layout"]
    col = jnp.arange(y.shape[1])[None, :]
    sum_from = (col < layout["n_one"]).astype(jnp.float32)
    return jnp.where(col < layout["n_sig"],
                     sum_from + jax.nn.sigmoid(y), _gelu_exact(y))


# ----------------------------- demo -----------------------------------------

if __name__ == "__main__":
    input_size = 32
    encoder_vector_sizes = [64, 64]
    raw_input_shape = (4, 16, 16)            # prod = 1024
    hidden_vector_shapes = [(8, 32), (16, 16)]
    num_channels_per_group = 16
    encoder_dropout = 0.1                    # identity at inference

    key = jax.random.PRNGKey(0)
    pkey, xkey, bkey = jax.random.split(key, 3)
    params = init_task_encoder_params(pkey, input_size, encoder_vector_sizes,
                                      raw_input_shape, hidden_vector_shapes,
                                      num_channels_per_group)
    x = jax.random.normal(xkey, (input_size,), jnp.float32)

    # --- single-task forward (module semantics) ---
    gamma_outs, beta_outs = task_encoder_forward(params, x)
    for o in gamma_outs + beta_outs:
        jax.block_until_ready(o)

    expected_shapes = [raw_input_shape] + hidden_vector_shapes
    assert [tuple(o.shape) for o in gamma_outs] == [tuple(s) for s in expected_shapes]
    assert [tuple(o.shape) for o in beta_outs] == [tuple(s) for s in expected_shapes]
    # gamma[0] = 1 + sigmoid(.) in [1, 2]; beta[0] = sigmoid(.) in [0, 1]
    assert bool(jnp.all(gamma_outs[0] >= 1.0)) and bool(jnp.all(gamma_outs[0] <= 2.0))
    assert bool(jnp.all(beta_outs[0] >= 0.0)) and bool(jnp.all(beta_outs[0] <= 1.0))

    # --- numerical check: single row ---
    y_kernel = fused_task_encoder(params, x.reshape(1, -1))
    y_ref = reference_forward_rows(params, x.reshape(1, -1))
    jax.block_until_ready(y_kernel)
    assert bool(jnp.allclose(y_kernel, y_ref, rtol=2e-2, atol=2e-2)), \
        "fused kernel does not match reference (single row)"

    # --- numerical check: batched rows exercising the M grid (parallel axis) ---
    xb = jax.random.normal(bkey, (40, input_size), jnp.float32)
    yb_kernel = fused_task_encoder(params, xb, block_m=16)   # grid = (3,)
    yb_ref = reference_forward_rows(params, xb)
    jax.block_until_ready(yb_kernel)
    assert yb_kernel.shape == (40, params["head_layout"]["total"])
    assert bool(jnp.allclose(yb_kernel, yb_ref, rtol=2e-2, atol=2e-2)), \
        "fused kernel does not match reference (batched rows)"

    print("KERNEL_OK")
</pallas_src>

<mosaic_0001>
module attributes {stable_mosaic.version = 11 : i64} {
  func.func @fused_task_encoder_kernel(%arg0: i32, %arg1: memref<8x32xf32, #tpu.memory_space<vmem>>, %arg2: memref<32x64xbf16, #tpu.memory_space<vmem>>, %arg3: memref<1x64xf32, #tpu.memory_space<vmem>>, %arg4: memref<1x64xf32, #tpu.memory_space<vmem>>, %arg5: memref<1x64xf32, #tpu.memory_space<vmem>>, %arg6: memref<64x64xbf16, #tpu.memory_space<vmem>>, %arg7: memref<1x64xf32, #tpu.memory_space<vmem>>, %arg8: memref<1x64xf32, #tpu.memory_space<vmem>>, %arg9: memref<1x64xf32, #tpu.memory_space<vmem>>, %arg10: memref<64x3072xbf16, #tpu.memory_space<vmem>>, %arg11: memref<1x3072xf32, #tpu.memory_space<vmem>>, %arg12: memref<8x3072xf32, #tpu.memory_space<vmem>>) attributes {dimension_semantics = [#tpu.dimension_semantics<parallel>], iteration_bounds = array<i64: 1>, scalar_prefetch = 0 : i64, scratch_operands = 0 : i64, tpu.core_type = #tpu.core_type<tc>, window_params = [{transform_indices = @transform_0, window_bounds = array<i64: 8, 32>}, {pipeline_mode = #tpu.pipeline_mode<synchronous>, transform_indices = @transform_1, window_bounds = array<i64: 32, 64>}, {pipeline_mode = #tpu.pipeline_mode<synchronous>, transform_indices = @transform_2, window_bounds = array<i64: 1, 64>}, {pipeline_mode = #tpu.pipeline_mode<synchronous>, transform_indices = @transform_3, window_bounds = array<i64: 1, 64>}, {pipeline_mode = #tpu.pipeline_mode<synchronous>, transform_indices = @transform_4, window_bounds = array<i64: 1, 64>}, {pipeline_mode = #tpu.pipeline_mode<synchronous>, transform_indices = @transform_5, window_bounds = array<i64: 64, 64>}, {pipeline_mode = #tpu.pipeline_mode<synchronous>, transform_indices = @transform_6, window_bounds = array<i64: 1, 64>}, {pipeline_mode = #tpu.pipeline_mode<synchronous>, transform_indices = @transform_7, window_bounds = array<i64: 1, 64>}, {pipeline_mode = #tpu.pipeline_mode<synchronous>, transform_indices = @transform_8, window_bounds = array<i64: 1, 64>}, {pipeline_mode = #tpu.pipeline_mode<synchronous>, transform_indices = @transform_9, window_bounds = array<i64: 64, 3072>}, {pipeline_mode = #tpu.pipeline_mode<synchronous>, transform_indices = @transform_10, window_bounds = array<i64: 1, 3072>}, {transform_indices = @transform_11, window_bounds = array<i64: 8, 3072>}]} {
    %c0 = arith.constant 0 : index
    %c0_0 = arith.constant 0 : index
    %0 = vector.load %arg1[%c0, %c0_0] : memref<8x32xf32, #tpu.memory_space<vmem>>, vector<8x32xf32>
    %c0_1 = arith.constant 0 : index
    %c0_2 = arith.constant 0 : index
    %1 = vector.load %arg2[%c0_1, %c0_2] : memref<32x64xbf16, #tpu.memory_space<vmem>>, vector<32x64xbf16>
    %2 = arith.truncf %0 : vector<8x32xf32> to vector<8x32xbf16>
    %cst = arith.constant dense<0.000000e+00> : vector<8x64xf32>
    %3 = tpu.matmul %2, %1, %cst {dimension_numbers = #tpu.dot_dimension_numbers<[1], [0], [0], [1], [0, 0, 1, 1], [], []>} : vector<8x32xbf16>, vector<32x64xbf16>, vector<8x64xf32> -> vector<8x64xf32>
    %c0_3 = arith.constant 0 : index
    %c0_4 = arith.constant 0 : index
    %4 = vector.load %arg3[%c0_3, %c0_4] : memref<1x64xf32, #tpu.memory_space<vmem>>, vector<1x64xf32>
    %5 = vector.broadcast %4 : vector<1x64xf32> to vector<8x64xf32>
    %6 = arith.addf %3, %5 : vector<8x64xf32>
    %cst_5 = arith.constant 5.000000e-01 : f32
    %7 = vector.broadcast %cst_5 : f32 to vector<8x64xf32>
    %8 = arith.mulf %7, %6 : vector<8x64xf32>
    %cst_6 = arith.constant 0.707106769 : f32
    %9 = vector.broadcast %cst_6 : f32 to vector<8x64xf32>
    %10 = arith.mulf %6, %9 : vector<8x64xf32>
    %11 = math.erf %10 : vector<8x64xf32>
    %cst_7 = arith.constant 1.000000e+00 : f32
    %12 = vector.broadcast %cst_7 : f32 to vector<8x64xf32>
    %13 = arith.addf %12, %11 : vector<8x64xf32>
    %14 = arith.mulf %8, %13 : vector<8x64xf32>
    %15 = tpu.iota {dimensions = array<i32: 0>} : vector<64x4xi32>
    %16 = tpu.iota {dimensions = array<i32: 1>} : vector<64x4xi32>
    %c16_i32 = arith.constant 16 : i32
    %17 = vector.broadcast %c16_i32 : i32 to vector<64x4xi32>
    %18 = arith.muli %16, %17 : vector<64x4xi32>
    %19 = arith.cmpi sge, %15, %18 : vector<64x4xi32>
    %c1_i32 = arith.constant 1 : i32
    %20 = vector.broadcast %c1_i32 : i32 to vector<64x4xi32>
    %21 = arith.addi %16, %20 : vector<64x4xi32>
    %c16_i32_8 = arith.constant 16 : i32
    %22 = vector.broadcast %c16_i32_8 : i32 to vector<64x4xi32>
    %23 = arith.muli %21, %22 : vector<64x4xi32>
    %24 = arith.cmpi slt, %15, %23 : vector<64x4xi32>
    %25 = arith.andi %19, %24 : vector<64x4xi1>
    %26 = arith.extui %25 : vector<64x4xi1> to vector<64x4xi32>
    %27 = arith.sitofp %26 : vector<64x4xi32> to vector<64x4xf32>
    %28 = tpu.iota {dimensions = array<i32: 1>} : vector<4x64xi32>
    %29 = tpu.iota {dimensions = array<i32: 0>} : vector<4x64xi32>
    %c16_i32_9 = arith.constant 16 : i32
    %30 = vector.broadcast %c16_i32_9 : i32 to vector<4x64xi32>
    %31 = arith.muli %29, %30 : vector<4x64xi32>
    %32 = arith.cmpi sge, %28, %31 : vector<4x64xi32>
    %c1_i32_10 = arith.constant 1 : i32
    %33 = vector.broadcast %c1_i32_10 : i32 to vector<4x64xi32>
    %34 = arith.addi %29, %33 : vector<4x64xi32>
    %c16_i32_11 = arith.constant 16 : i32
    %35 = vector.broadcast %c16_i32_11 : i32 to vector<4x64xi32>
    %36 = arith.muli %34, %35 : vector<4x64xi32>
    %37 = arith.cmpi slt, %28, %36 : vector<4x64xi32>
    %38 = arith.andi %32, %37 : vector<4x64xi1>
    %39 = arith.extui %38 : vector<4x64xi1> to vector<4x64xi32>
    %40 = arith.sitofp %39 : vector<4x64xi32> to vector<4x64xf32>
    %c0_12 = arith.constant 0 : index
    %c0_13 = arith.constant 0 : index
    %41 = vector.load %arg4[%c0_12, %c0_13] : memref<1x64xf32, #tpu.memory_space<vmem>>, vector<1x64xf32>
    %c0_14 = arith.constant 0 : index
    %c0_15 = arith.constant 0 : index
    %42 = vector.load %arg5[%c0_14, %c0_15] : memref<1x64xf32, #tpu.memory_space<vmem>>, vector<1x64xf32>
    %cst_16 = arith.constant dense<0.000000e+00> : vector<8x4xf32>
    %43 = tpu.matmul %14, %27, %cst_16 {dimension_numbers = #tpu.dot_dimension_numbers<[1], [0], [0], [1], [0, 0, 1, 1], [], []>} : vector<8x64xf32>, vector<64x4xf32>, vector<8x4xf32> -> vector<8x4xf32>
    %cst_17 = arith.constant 6.250000e-02 : f32
    %44 = vector.broadcast %cst_17 : f32 to vector<8x4xf32>
    %45 = arith.mulf %43, %44 : vector<8x4xf32>
    %cst_18 = arith.constant dense<0.000000e+00> : vector<8x64xf32>
    %46 = tpu.matmul %45, %40, %cst_18 {dimension_numbers = #tpu.dot_dimension_numbers<[1], [0], [0], [1], [0, 0, 1, 1], [], []>} : vector<8x4xf32>, vector<4x64xf32>, vector<8x64xf32> -> vector<8x64xf32>
    %47 = arith.subf %14, %46 : vector<8x64xf32>
    %48 = arith.mulf %47, %47 : vector<8x64xf32>
    %cst_19 = arith.constant dense<0.000000e+00> : vector<8x4xf32>
    %49 = tpu.matmul %48, %27, %cst_19 {dimension_numbers = #tpu.dot_dimension_numbers<[1], [0], [0], [1], [0, 0, 1, 1], [], []>} : vector<8x64xf32>, vector<64x4xf32>, vector<8x4xf32> -> vector<8x4xf32>
    %cst_20 = arith.constant 6.250000e-02 : f32
    %50 = vector.broadcast %cst_20 : f32 to vector<8x4xf32>
    %51 = arith.mulf %49, %50 : vector<8x4xf32>
    %cst_21 = arith.constant 9.99999974E-6 : f32
    %52 = vector.broadcast %cst_21 : f32 to vector<8x4xf32>
    %53 = arith.addf %51, %52 : vector<8x4xf32>
    %54 = math.rsqrt %53 : vector<8x4xf32>
    %cst_22 = arith.constant dense<0.000000e+00> : vector<8x64xf32>
    %55 = tpu.matmul %54, %40, %cst_22 {dimension_numbers = #tpu.dot_dimension_numbers<[1], [0], [0], [1], [0, 0, 1, 1], [], []>} : vector<8x4xf32>, vector<4x64xf32>, vector<8x64xf32> -> vector<8x64xf32>
    %56 = arith.mulf %47, %55 : vector<8x64xf32>
    %57 = vector.broadcast %41 : vector<1x64xf32> to vector<8x64xf32>
    %58 = arith.mulf %56, %57 : vector<8x64xf32>
    %59 = vector.broadcast %42 : vector<1x64xf32> to vector<8x64xf32>
    %60 = arith.addf %58, %59 : vector<8x64xf32>
    %c0_23 = arith.constant 0 : index
    %c0_24 = arith.constant 0 : index
    %61 = vector.load %arg6[%c0_23, %c0_24] : memref<64x64xbf16, #tpu.memory_space<vmem>>, vector<64x64xbf16>
    %62 = arith.truncf %60 : vector<8x64xf32> to vector<8x64xbf16>
    %cst_25 = arith.constant dense<0.000000e+00> : vector<8x64xf32>
    %63 = tpu.matmul %62, %61, %cst_25 {dimension_numbers = #tpu.dot_dimension_numbers<[1], [0], [0], [1], [0, 0, 1, 1], [], []>} : vector<8x64xbf16>, vector<64x64xbf16>, vector<8x64xf32> -> vector<8x64xf32>
    %c0_26 = arith.constant 0 : index
    %c0_27 = arith.constant 0 : index
    %64 = vector.load %arg7[%c0_26, %c0_27] : memref<1x64xf32, #tpu.memory_space<vmem>>, vector<1x64xf32>
    %65 = vector.broadcast %64 : vector<1x64xf32> to vector<8x64xf32>
    %66 = arith.addf %63, %65 : vector<8x64xf32>
    %cst_28 = arith.constant 5.000000e-01 : f32
    %67 = vector.broadcast %cst_28 : f32 to vector<8x64xf32>
    %68 = arith.mulf %67, %66 : vector<8x64xf32>
    %cst_29 = arith.constant 0.707106769 : f32
    %69 = vector.broadcast %cst_29 : f32 to vector<8x64xf32>
    %70 = arith.mulf %66, %69 : vector<8x64xf32>
    %71 = math.erf %70 : vector<8x64xf32>
    %cst_30 = arith.constant 1.000000e+00 : f32
    %72 = vector.broadcast %cst_30 : f32 to vector<8x64xf32>
    %73 = arith.addf %72, %71 : vector<8x64xf32>
    %74 = arith.mulf %68, %73 : vector<8x64xf32>
    %c0_31 = arith.constant 0 : index
    %c0_32 = arith.constant 0 : index
    %75 = vector.load %arg8[%c0_31, %c0_32] : memref<1x64xf32, #tpu.memory_space<vmem>>, vector<1x64xf32>
    %c0_33 = arith.constant 0 : index
    %c0_34 = arith.constant 0 : index
    %76 = vector.load %arg9[%c0_33, %c0_34] : memref<1x64xf32, #tpu.memory_space<vmem>>, vector<1x64xf32>
    %cst_35 = arith.constant dense<0.000000e+00> : vector<8x4xf32>
    %77 = tpu.matmul %74, %27, %cst_35 {dimension_numbers = #tpu.dot_dimension_numbers<[1], [0], [0], [1], [0, 0, 1, 1], [], []>} : vector<8x64xf32>, vector<64x4xf32>, vector<8x4xf32> -> vector<8x4xf32>
    %cst_36 = arith.constant 6.250000e-02 : f32
    %78 = vector.broadcast %cst_36 : f32 to vector<8x4xf32>
    %79 = arith.mulf %77, %78 : vector<8x4xf32>
    %cst_37 = arith.constant dense<0.000000e+00> : vector<8x64xf32>
    %80 = tpu.matmul %79, %40, %cst_37 {dimension_numbers = #tpu.dot_dimension_numbers<[1], [0], [0], [1], [0, 0, 1, 1], [], []>} : vector<8x4xf32>, vector<4x64xf32>, vector<8x64xf32> -> vector<8x64xf32>
    %81 = arith.subf %74, %80 : vector<8x64xf32>
    %82 = arith.mulf %81, %81 : vector<8x64xf32>
    %cst_38 = arith.constant dense<0.000000e+00> : vector<8x4xf32>
    %83 = tpu.matmul %82, %27, %cst_38 {dimension_numbers = #tpu.dot_dimension_numbers<[1], [0], [0], [1], [0, 0, 1, 1], [], []>} : vector<8x64xf32>, vector<64x4xf32>, vector<8x4xf32> -> vector<8x4xf32>
    %cst_39 = arith.constant 6.250000e-02 : f32
    %84 = vector.broadcast %cst_39 : f32 to vector<8x4xf32>
    %85 = arith.mulf %83, %84 : vector<8x4xf32>
    %cst_40 = arith.constant 9.99999974E-6 : f32
    %86 = vector.broadcast %cst_40 : f32 to vector<8x4xf32>
    %87 = arith.addf %85, %86 : vector<8x4xf32>
    %88 = math.rsqrt %87 : vector<8x4xf32>
    %cst_41 = arith.constant dense<0.000000e+00> : vector<8x64xf32>
    %89 = tpu.matmul %88, %40, %cst_41 {dimension_numbers = #tpu.dot_dimension_numbers<[1], [0], [0], [1], [0, 0, 1, 1], [], []>} : vector<8x4xf32>, vector<4x64xf32>, vector<8x64xf32> -> vector<8x64xf32>
    %90 = arith.mulf %81, %89 : vector<8x64xf32>
    %91 = vector.broadcast %75 : vector<1x64xf32> to vector<8x64xf32>
    %92 = arith.mulf %90, %91 : vector<8x64xf32>
    %93 = vector.broadcast %76 : vector<1x64xf32> to vector<8x64xf32>
    %94 = arith.addf %92, %93 : vector<8x64xf32>
    %c0_42 = arith.constant 0 : index
    %c0_43 = arith.constant 0 : index
    %95 = vector.load %arg10[%c0_42, %c0_43] : memref<64x3072xbf16, #tpu.memory_space<vmem>>, vector<64x3072xbf16>
    %96 = arith.truncf %94 : vector<8x64xf32> to vector<8x64xbf16>
    %cst_44 = arith.constant dense<0.000000e+00> : vector<8x3072xf32>
    %97 = tpu.matmul %96, %95, %cst_44 {dimension_numbers = #tpu.dot_dimension_numbers<[1], [0], [0], [1], [0, 0, 1, 1], [], []>} : vector<8x64xbf16>, vector<64x3072xbf16>, vector<8x3072xf32> -> vector<8x3072xf32>
    %c0_45 = arith.constant 0 : index
    %c0_46 = arith.constant 0 : index
    %98 = vector.load %arg11[%c0_45, %c0_46] : memref<1x3072xf32, #tpu.memory_space<vmem>>, vector<1x3072xf32>
    %99 = vector.broadcast %98 : vector<1x3072xf32> to vector<8x3072xf32>
    %100 = arith.addf %97, %99 : vector<8x3072xf32>
    %101 = vector.extract_strided_slice %100 {offsets = [0, 0], sizes = [8, 1024], strides = [1, 1]} : vector<8x3072xf32> to vector<8x1024xf32>
    %102 = arith.negf %101 : vector<8x1024xf32>
    %103 = math.exp %102 : vector<8x1024xf32>
    %cst_47 = arith.constant 1.000000e+00 : f32
    %104 = vector.broadcast %cst_47 : f32 to vector<8x1024xf32>
    %105 = arith.addf %104, %103 : vector<8x1024xf32>
    %106 = arith.divf %104, %105 : vector<8x1024xf32>
    %cst_48 = arith.constant 1.000000e+00 : f32
    %107 = vector.broadcast %cst_48 : f32 to vector<8x1024xf32>
    %108 = arith.addf %107, %106 : vector<8x1024xf32>
    %c0_49 = arith.constant 0 : index
    %c0_50 = arith.constant 0 : index
    %109 = vector.load %arg12[%c0_49, %c0_50] : memref<8x3072xf32, #tpu.memory_space<vmem>>, vector<8x1024xf32>
    tpu.vector_store %arg12[%c0_49, %c0_50], %108 {strides = array<i32>} : memref<8x3072xf32, #tpu.memory_space<vmem>>, vector<8x1024xf32>,
    %110 = vector.extract_strided_slice %100 {offsets = [0, 1024], sizes = [8, 1024], strides = [1, 1]} : vector<8x3072xf32> to vector<8x1024xf32>
    %111 = arith.negf %110 : vector<8x1024xf32>
    %112 = math.exp %111 : vector<8x1024xf32>
    %cst_51 = arith.constant 1.000000e+00 : f32
    %113 = vector.broadcast %cst_51 : f32 to vector<8x1024xf32>
    %114 = arith.addf %113, %112 : vector<8x1024xf32>
    %115 = arith.divf %113, %114 : vector<8x1024xf32>
    %c0_52 = arith.constant 0 : index
    %c1024 = arith.constant 1024 : index
    %116 = vector.load %arg12[%c0_52, %c1024] : memref<8x3072xf32, #tpu.memory_space<vmem>>, vector<8x1024xf32>
    tpu.vector_store %arg12[%c0_52, %c1024], %115 {strides = array<i32>} : memref<8x3072xf32, #tpu.memory_space<vmem>>, vector<8x1024xf32>,
    %117 = vector.extract_strided_slice %100 {offsets = [0, 2048], sizes = [8, 1024], strides = [1, 1]} : vector<8x3072xf32> to vector<8x1024xf32>
    %cst_53 = arith.constant 5.000000e-01 : f32
    %118 = vector.broadcast %cst_53 : f32 to vector<8x1024xf32>
    %119 = arith.mulf %118, %117 : vector<8x1024xf32>
    %cst_54 = arith.constant 0.707106769 : f32
    %120 = vector.broadcast %cst_54 : f32 to vector<8x1024xf32>
    %121 = arith.mulf %117, %120 : vector<8x1024xf32>
    %122 = math.erf %121 : vector<8x1024xf32>
    %cst_55 = arith.constant 1.000000e+00 : f32
    %123 = vector.broadcast %cst_55 : f32 to vector<8x1024xf32>
    %124 = arith.addf %123, %122 : vector<8x1024xf32>
    %125 = arith.mulf %119, %124 : vector<8x1024xf32>
    %c0_56 = arith.constant 0 : index
    %c2048 = arith.constant 2048 : index
    %126 = vector.load %arg12[%c0_56, %c2048] : memref<8x3072xf32, #tpu.memory_space<vmem>>, vector<8x1024xf32>
    tpu.vector_store %arg12[%c0_56, %c2048], %125 {strides = array<i32>} : memref<8x3072xf32, #tpu.memory_space<vmem>>, vector<8x1024xf32>,
    return
  }
  func.func @transform_0(%arg0: i32) -> (i32, i32) {
    %c0_i32 = arith.constant 0 : i32
    %c0_i32_0 = arith.constant 0 : i32
    return %arg0, %c0_i32 : i32, i32
  }
  func.func @transform_1(%arg0: i32) -> (i32, i32) {
    %c0_i32 = arith.constant 0 : i32
    %c0_i32_0 = arith.constant 0 : i32
    %c0_i32_1 = arith.constant 0 : i32
    return %c0_i32, %c0_i32_0 : i32, i32
  }
  func.func @transform_2(%arg0: i32) -> (i32, i32) {
    %c0_i32 = arith.constant 0 : i32
    %c0_i32_0 = arith.constant 0 : i32
    %c0_i32_1 = arith.constant 0 : i32
    return %c0_i32, %c0_i32_0 : i32, i32
  }
  func.func @transform_3(%arg0: i32) -> (i32, i32) {
    %c0_i32 = arith.constant 0 : i32
    %c0_i32_0 = arith.constant 0 : i32
    %c0_i32_1 = arith.constant 0 : i32
    return %c0_i32, %c0_i32_0 : i32, i32
  }
  func.func @transform_4(%arg0: i32) -> (i32, i32) {
    %c0_i32 = arith.constant 0 : i32
    %c0_i32_0 = arith.constant 0 : i32
    %c0_i32_1 = arith.constant 0 : i32
    return %c0_i32, %c0_i32_0 : i32, i32
  }
  func.func @transform_5(%arg0: i32) -> (i32, i32) {
    %c0_i32 = arith.constant 0 : i32
    %c0_i32_0 = arith.constant 0 : i32
    %c0_i32_1 = arith.constant 0 : i32
    return %c0_i32, %c0_i32_0 : i32, i32
  }
  func.func @transform_6(%arg0: i32) -> (i32, i32) {
    %c0_i32 = arith.constant 0 : i32
    %c0_i32_0 = arith.constant 0 : i32
    %c0_i32_1 = arith.constant 0 : i32
    return %c0_i32, %c0_i32_0 : i32, i32
  }
  func.func @transform_7(%arg0: i32) -> (i32, i32) {
    %c0_i32 = arith.constant 0 : i32
    %c0_i32_0 = arith.constant 0 : i32
    %c0_i32_1 = arith.constant 0 : i32
    return %c0_i32, %c0_i32_0 : i32, i32
  }
  func.func @transform_8(%arg0: i32) -> (i32, i32) {
    %c0_i32 = arith.constant 0 : i32
    %c0_i32_0 = arith.constant 0 : i32
    %c0_i32_1 = arith.constant 0 : i32
    return %c0_i32, %c0_i32_0 : i32, i32
  }
  func.func @transform_9(%arg0: i32) -> (i32, i32) {
    %c0_i32 = arith.constant 0 : i32
    %c0_i32_0 = arith.constant 0 : i32
    %c0_i32_1 = arith.constant 0 : i32
    return %c0_i32, %c0_i32_0 : i32, i32
  }
  func.func @transform_10(%arg0: i32) -> (i32, i32) {
    %c0_i32 = arith.constant 0 : i32
    %c0_i32_0 = arith.constant 0 : i32
    %c0_i32_1 = arith.constant 0 : i32
    return %c0_i32, %c0_i32_0 : i32, i32
  }
  func.func @transform_11(%arg0: i32) -> (i32, i32) {
    %c0_i32 = arith.constant 0 : i32
    %c0_i32_0 = arith.constant 0 : i32
    return %arg0, %c0_i32 : i32, i32
  }
}

</mosaic_0001>

<bundles_post_ra>
// kernel: tpu_custom_call.1
= control target key start
LH: loop header
LB: loop body
LE: loop exit
PB: predicated region body
PF: predicated region fallthrough
CT: control target
= control target key end

     0   :  { %16 = vsyncpa [#allocation3], 0  ;;  %s3390_s0 = inlined_call_operand.hbm [shape: f32[8,32], index: 0, kind: input, shape index: {}]   ;;  %s3391_s1 = inlined_call_operand.hbm [shape: bf16[32,64], index: 1, kind: input, shape index: {}]   ;;  %s3392_s2 = inlined_call_operand.vmem [shape: f32[1,64], index: 2, kind: input, shape index: {}]   ;;  %s3393_s3 = inlined_call_operand.vmem [shape: f32[1,64], index: 3, kind: input, shape index: {}]   ;;  %s3394_s4 = inlined_call_operand.vmem [shape: f32[1,64], index: 4, kind: input, shape index: {}]   ;;  %s3395_s5 = inlined_call_operand.hbm [shape: bf16[64,64], index: 5, kind: input, shape index: {}]   ;;  %s3396_s6 = inlined_call_operand.vmem [shape: f32[1,64], index: 6, kind: input, shape index: {}]   ;;  %s3397_s7 = inlined_call_operand.vmem [shape: f32[1,64], index: 7, kind: input, shape index: {}]   ;;  %s3398_s8 = inlined_call_operand.vmem [shape: f32[1,64], index: 8, kind: input, shape index: {}]   ;;  %s3399_s9 = inlined_call_operand.hbm [shape: bf16[64,3072], index: 9, kind: input, shape index: {}]   ;;  %s3400_s10 = inlined_call_operand.vmem [shape: f32[1,3072], index: 10, kind: input, shape index: {}]   ;;  %s3401_s11 = inlined_call_operand.hbm [shape: f32[8,3072], index: 11, kind: output, shape index: {}]  }
   0x1   :  { %17 = vsyncpa [#allocation6], 0 }
   0x2   :  { %18 = vsyncpa [#allocation9], 0 }
   0x3   :  { %19 = vsyncpa [#allocation4], 0  ;;  %s2969_s17 = smov [#allocation5]   ;;  %s2851_s21 = scalar_lea.hbm %s3391_s1, 256 }
   0x4   :  { %s35_s18 = sshll.u32 %s2969_s17, 4  ;;  %p2852_p0 = scmp.ne.s32.totalorder %s3391_s1, %s2851_s21  ;;  %s36_s18 = int_to_ptr.vmem [resolvable:$true] %s35_s18 }
   0x5   :  { %p2855_p1 = scmp.lt.u32.totalorder %s2851_s21, %s3391_s1 }
   0x7   :  { %p2857_p2 = pnand %p2855_p1, %p2852_p0 }
   0x9   :  { %2860 = shalt.err (!%p2857_p2)
}
   0xa   :  { %s2861_s26 = scalar_lea.vmem %s36_s18, 256  ;;  %p2866_p4 = scmp.lt.s32.totalorder %s36_s18, %s36_s18 }
   0xb   :  { %p2862_p3 = scmp.ne.s32.totalorder %s36_s18, %s2861_s26  ;;  %p2867_p5 = scmp.lt.s32.totalorder %s2861_s26, %s2861_s26 }
   0xd   :  { %p2868_p6 = por %p2867_p5, %p2866_p4 }
   0xf   :  { %p2869_p7 = pnand %p2868_p6, %p2862_p3 }
  0x11   :  { %2872 = shalt.err (!%p2869_p7)
}
  0x12   :  { %s2970_s27 = smov 64   ;;  %s2971_s28 = smov 4  }
  0x13   :  { %41 = dma.hbm_to_vmem [thread:$0]  %s3391_s1, 256, %s36_s18, [#allocation6], %s2970_s27, %s2970_s27, %s2971_s28  }
  0x14   :  { %s2972_s12 = smov [#allocation2]   ;;  %s2973_s14 = smov [#allocation7]  }
  0x15   :  { %s26_s13 = sshll.u32 %s2972_s12, 4  ;;  %s53_s15 = sshll.u32 %s2973_s14, 4  ;;  %s27_s13 = int_to_ptr.vmem [resolvable:$true] %s26_s13  ;;  %s54_s15 = int_to_ptr.vmem [resolvable:$true] %s53_s15 }
  0x16   :  { %s2873_s19 = scalar_lea.hbm %s3390_s0, 128 }
  0x17   :  { %p2874_p8 = scmp.ne.s32.totalorder %s3390_s0, %s2873_s19  ;;  %p2877_p9 = scmp.lt.u32.totalorder %s2873_s19, %s3390_s0 }
  0x19   :  { %p2879_p10 = pnand %p2877_p9, %p2874_p8 }
  0x1b   :  { %2882 = shalt.err (!%p2879_p10)
}
  0x1c   :  { %s2883_s1 = scalar_lea.vmem %s27_s13, 128  ;;  %p2888_p12 = scmp.lt.s32.totalorder %s27_s13, %s27_s13 }
  0x1d   :  { %p2884_p11 = scmp.ne.s32.totalorder %s27_s13, %s2883_s1  ;;  %p2889_p13 = scmp.lt.s32.totalorder %s2883_s1, %s2883_s1 }
  0x1f   :  { %p2890_p0 = por %p2889_p13, %p2888_p12 }
  0x21   :  { %p2891_p1 = pnand %p2890_p0, %p2884_p11 }
  0x23   :  { %2894 = shalt.err (!%p2891_p1)
}
  0x24   :  { %29 = dma.hbm_to_vmem [thread:$0]  %s3390_s0, 128, %s27_s13, [#allocation3]  }
  0x25   :  { %s2895_s29 = scalar_lea.hbm %s3395_s5, 512 }
  0x26   :  { %p2896_p2 = scmp.ne.s32.totalorder %s3395_s5, %s2895_s29  ;;  %p2899_p3 = scmp.lt.u32.totalorder %s2895_s29, %s3395_s5 }
  0x28   :  { %p2901_p4 = pnand %p2899_p3, %p2896_p2 }
  0x2a   :  { %2904 = shalt.err (!%p2901_p4)
}
  0x2b   :  { %s2905_s17 = scalar_lea.vmem %s54_s15, 512  ;;  %p2910_p6 = scmp.lt.s32.totalorder %s54_s15, %s54_s15 }
  0x2c   :  { %p2906_p5 = scmp.ne.s32.totalorder %s54_s15, %s2905_s17  ;;  %p2911_p7 = scmp.lt.s32.totalorder %s2905_s17, %s2905_s17 }
  0x2e   :  { %p2912_p8 = por %p2911_p7, %p2910_p6 }
  0x30   :  { %p2913_p9 = pnand %p2912_p8, %p2906_p5 }
  0x32   :  { %2916 = shalt.err (!%p2913_p9)
}
  0x33   :  { %59 = dma.hbm_to_vmem [thread:$0]  %s3395_s5, 512, %s54_s15, [#allocation6], %s2970_s27, %s2970_s27, %s2971_s28  }
  0x34   :  { %s2974_s19 = smov [#allocation8]   ;;  %s2917_s23 = scalar_lea.hbm %s3399_s9, 12288 }
  0x35   :  { %s71_s20 = sshll.u32 %s2974_s19, 4  ;;  %p2918_p10 = scmp.ne.s32.totalorder %s3399_s9, %s2917_s23  ;;  %s72_s20 = int_to_ptr.vmem [resolvable:$true] %s71_s20 }
  0x36   :  { %p2921_p11 = scmp.lt.u32.totalorder %s2917_s23, %s3399_s9 }
  0x38   :  { %p2923_p12 = pnand %p2921_p11, %p2918_p10 }
  0x3a   :  { %2926 = shalt.err (!%p2923_p12)
}
  0x3b   :  { %s2927_s26 = scalar_lea.vmem %s72_s20, 12288  ;;  %p2932_p0 = scmp.lt.s32.totalorder %s72_s20, %s72_s20 }
  0x3c   :  { %p2928_p13 = scmp.ne.s32.totalorder %s72_s20, %s2927_s26  ;;  %p2933_p1 = scmp.lt.s32.totalorder %s2927_s26, %s2927_s26 }
  0x3e   :  { %p2934_p2 = por %p2933_p1, %p2932_p0 }
  0x40   :  { %p2935_p3 = pnand %p2934_p2, %p2928_p13 }
  0x42   :  { %2938 = shalt.err (!%p2935_p3)
}
  0x43   :  { %s2975_s5 = smov 1536   ;;  %s2976_s27 = smov 96  }
  0x44   :  { %77 = dma.hbm_to_vmem [thread:$0]  %s3399_s9, 12288, %s72_s20, [#allocation9], %s2975_s5, %s2975_s5, %s2976_s27  }
  0x45   :  { %2961 = dma.done.wait [#allocation3], 128  }
  0x46   :  { %2962 = vsyncadd [#allocation3], 4294967168 }
  0x47   :  { %2963 = dma.done.wait [#allocation6], 768  }
  0x48   :  { %2964 = vsyncadd [#allocation6], 4294966528 }
  0x49   :  { %2965 = dma.done.wait [#allocation9], 12288  }
  0x4a   :  { %2966 = vsyncadd [#allocation9], 4294955008  ;;  %v2977_v0 = vmov 0.0   ;;  %vm2978_vm0 = vmmov 0   ;;  %v2757_v1 = vld [vmem:[#allocation5] sm:$0xff]   ;;  %v2758_v2 = vld [vmem:[#allocation5 + $0x8] sm:$0xff]   ;;  %v167_v5 = vlaneseq }
  0x4b   :  { %2579 = vmatprep.subr.bf16.mxu0 %v2977_v0  ;;  %2583 = vmatprep.mubr.msk.bf16.mxu0 %vm2978_vm0, %v2977_v0  ;;  %v93_v3 = vld [vmem:[#allocation2] sm:$0xff]  ;;  %vm118_vm1 = vcmask 261120   ;;  %v2979_v12 = vmov 0.0|0.0   ;;  %v2980_v16 = vmov 1.0|1.0   ;;  %v2759_v46 = vld [vmem:[#allocation7] sm:$0xff]  }
  0x4c   :  { %2603 = vmatprep.mubr.msk.f32.mxu1 %vm2978_vm0, %v2977_v0  ;;  %2580 = vmatpush3.bf16.msra.mxu0 %v2757_v1  ;;  %v98_v4 = vpack.c.bf16 %v93_v3, %v93_v3  ;;  %v177_v6 = vand.u32 127, %v167_v5  ;;  %v3106_v7 = vshrl.u32 %v167_v5, 7  ;;  %v2336_v28 = vld [vmem:[%s3392_s2] ss:$0 sm:$0xff]  ;;  %v2760_v47 = vld [vmem:[#allocation7 + $0x8] sm:$0xff]   ;;  %v2762_v54 = vld [vmem:[#allocation7 + $0x18] sm:$0xff]  }
  0x4d   :  { %2581 = vmatprep.subr.bf16.mxu0 %v2977_v0  ;;  %2695 = vmatprep.subr.bf16.mxu1 %v2979_v12  ;;  %v2761_v53 = vld [vmem:[#allocation7 + $0x10] sm:$0xff]   ;;  %v990_v23 = vld [vmem:[#allocation8 + $0x128] sm:$0xff] }
  0x4e   :  { %v187_v8 = vadd.s32 1, %v177_v6  ;;  %v169_v9 = vadd.s32 8, %v3106_v7  ;;  %v178_v10 = vmul.u32 16, %v177_v6  ;;  %v170_v13 = vadd.s32 16, %v3106_v7  ;;  %v2371_v55 = vld [vmem:[%s3393_s3] ss:$0 sm:$0xff] }
  0x4f   :  { %v171_v14 = vadd.s32 24, %v3106_v7  ;;  %v172_v17 = vadd.s32 32, %v3106_v7  ;;  %v173_v18 = vadd.s32 40, %v3106_v7  ;;  %v174_v20 = vadd.s32 48, %v3106_v7  ;;  %v2372_v59 = vld [vmem:[%s3394_s4] ss:$0 sm:$0xff] }
  0x50   :  { %2582 = vmatpush3.bf16.msra.mxu0 %v2758_v2  ;;  %v188_v11 = vmul.u32 16, %v187_v8  ;;  %vm179_vm2 = vcmp.ge.s32.totalorder %v3106_v7, %v178_v10  ;;  %vm180_vm3 = vcmp.ge.s32.totalorder %v169_v9, %v178_v10  ;;  %vm181_vm9 = vcmp.ge.s32.totalorder %v170_v13, %v178_v10  ;;  %v2373_v63 = vld [vmem:[%s3396_s6] ss:$0 sm:$0xff] }
  0x51   :  { %2606 = vmatprep.subr.mxu0 %v2977_v0  ;;  %vm182_vm10 = vcmp.ge.s32.totalorder %v171_v14, %v178_v10  ;;  %v175_v21 = vadd.s32 56, %v3106_v7  ;;  %v221_v24 = vmul.u32 16, %v3106_v7  ;;  %v223_v25 = vadd.s32 1, %v3106_v7 }
  0x52   :  { %vm189_vm4 = vcmp.lt.s32.totalorder %v3106_v7, %v188_v11  ;;  %vm190_vm5 = vcmp.lt.s32.totalorder %v169_v9, %v188_v11  ;;  %vm191_vm11 = vcmp.lt.s32.totalorder %v170_v13, %v188_v11  ;;  %vm192_vm12 = vcmp.lt.s32.totalorder %v171_v14, %v188_v11 }
  0x53   :  { %2584 = vmatmul.mubr.msk.bf16.vlgmr.msra.gmra.mrb[0].mxu0 %vm118_vm1, %v98_v4  ;;  %vm197_vm6 = vmand %vm179_vm2, %vm189_vm4  ;;  %vm183_vm1 = vcmp.ge.s32.totalorder %v172_v17, %v178_v10  ;;  %vm184_vm2 = vcmp.ge.s32.totalorder %v173_v18, %v178_v10  ;;  %vm194_vm4 = vcmp.lt.s32.totalorder %v173_v18, %v188_v11  ;;  %v224_v26 = vmul.u32 16, %v223_v25 }
  0x54   :  { %2608 = vmatprep.mubr.msk.f32.mxu0 %vm2978_vm0, %v2977_v0  ;;  %vm198_vm7 = vmand %vm180_vm3, %vm190_vm5  ;;  %vm193_vm3 = vcmp.lt.s32.totalorder %v172_v17, %v188_v11 }
  0x55   :  { %vm3114_vm8 = vmpackc.low %vm198_vm7, %vm197_vm6 }
  0x56   :  { %2697 = vmatpush3.bf16.msk.msra.mxu1 %vm3114_vm8, %v2980_v16  ;;  %vm199_vm13 = vmand %vm181_vm9, %vm191_vm11  ;;  %vm185_vm9 = vcmp.ge.s32.totalorder %v174_v20, %v178_v10  ;;  %vm195_vm11 = vcmp.lt.s32.totalorder %v174_v20, %v188_v11  ;;  %v953_v20 = vld [vmem:[#allocation8] sm:$0xff] }
  0x57   :  { %2698 = vmatprep.subr.bf16.mxu1 %v2979_v12  ;;  %vm200_vm14 = vmand %vm182_vm10, %vm192_vm12  ;;  %vm186_vm10 = vcmp.ge.s32.totalorder %v175_v21, %v178_v10  ;;  %vm196_vm12 = vcmp.lt.s32.totalorder %v175_v21, %v188_v11  ;;  %v965_v21 = vld [vmem:[#allocation8 + $0x60] sm:$0xff] }
  0x58   :  { %vm3124_vm15 = vmpackc.low %vm200_vm14, %vm199_vm13  ;;  %v2403_v22 = vcombine.low %v953_v20, %v965_v21  ;;  %v2404_v25 = vcombine.high %v953_v20, %v965_v21  ;;  %v1004_v20 = vld [vmem:[#allocation8 + $0x198] sm:$0xff] }
  0x59   :  { %vm201_vm5 = vmand %vm183_vm1, %vm193_vm3  ;;  %vm225_vm3 = vcmp.lt.s32.totalorder %v177_v6, %v224_v26  ;;  %v966_v26 = vld [vmem:[#allocation8 + $0x68] sm:$0xff]  ;;  %v1016_v21 = vld [vmem:[#allocation8 + $0x1f8] sm:$0xff] }
  0x5a   :  { %2700 = vmatpush3.bf16.msk.msra.mxu1 %vm3124_vm15, %v2980_v16  ;;  %vm202_vm6 = vmand %vm184_vm2, %vm194_vm4  ;;  %vm222_vm2 = vcmp.ge.s32.totalorder %v177_v6, %v221_v24  ;;  %vm310_vm4 = vcmask 1043456   ;;  %v954_v24 = vld [vmem:[#allocation8 + $0x8] sm:$0xff] }
  0x5b   :  { %2701 = vmatprep.subr.bf16.mxu1 %v2979_v12  ;;  %vm3134_vm7 = vmpackc.low %vm202_vm6, %vm201_vm5  ;;  %vm231_vm6 = vcmask 523264  }
  0x5c   :  { %vm203_vm13 = vmand %vm185_vm9, %vm195_vm11  ;;  %vm306_vm9 = vcmask 31744  }
  0x5d   :  { %vm204_vm14 = vmand %vm186_vm10, %vm196_vm12 }
  0x5e   :  { %2703 = vmatpush3.bf16.msk.msra.mxu1 %vm3134_vm7, %v2980_v16  ;;  %vm3142_vm1 = vmpackc.low %vm204_vm14, %vm203_vm13 }
  0x5f   :  { %2704 = vmatprep.subr.bf16.mxu1 %v2979_v12  ;;  %vm226_vm5 = vmand %vm222_vm2, %vm225_vm3 }
  0x60   :  { %v3153_v27 = vsel %vm226_vm5, 1.0, %v2977_v0 }
  0x61   :  { %2607 = vmatpush3.msk.msra.mxu0 %vm310_vm4, %v3153_v27 }
  0x62   :  { %2706 = vmatpush3.bf16.msk.msra.mxu1 %vm3142_vm1, %v2980_v16  ;;  %2707 = vmatprep.subr.bf16.mxu0 %v2979_v12 }
  0x63   :  { %2635 = vmatprep.subr.bf16.mxu1 %v2977_v0 }
 0x126   :  { %v156_v29 = vpop.f32.mrb[0].mxu0 }
 0x127   :  { %v157_v30 = vadd.f32 %v2336_v28, %v156_v29  ;;  %v2585_v31 = vpop.f32.mrb[1].mxu0  ;;  %v978_v28 = vld [vmem:[#allocation8 + $0xc8] sm:$0xff] }
 0x128   :  { %v159_v32 = vpop.f32.mrb[2].mxu0  ;;  %v2429_v29 = vcombine.low %v978_v28, %v990_v23 }
 0x129   :  { %v163_v33 = vmul.f32 0.70710677, %v157_v30  ;;  %v2586_v34 = vpop.f32.mrb[3].mxu0  ;;  %v162_v36 = vmul.f32 0.5, %v157_v30 }
 0x12a   :  { %v977_v34 = vld [vmem:[#allocation8 + $0xc0] sm:$0xff] }
 0x12b   :  { %2763 = verf.f32 %v163_v33 }
 0x135   :  { %v2764_v35 = vpop.eup %2763 }
 0x136   :  { %v165_v37 = vadd.f32 1.0, %v2764_v35  ;;  %v989_v35 = vld [vmem:[#allocation8 + $0x120] sm:$0xff] }
 0x138   :  { %v166_v38 = vmul.f32 %v165_v37, %v162_v36  ;;  %v2428_v36 = vcombine.high %v977_v34, %v989_v35 }
 0x13a   :  { %2604 = vmatmul.mubr.msk.f32.vlgmr.msra.gmra.mrb[0].mxu1 %vm231_vm6, %v166_v38 }
 0x13b   :  { %2643 = vmatprep.mubr.msk.bf16.mxu1 %vm2978_vm0, %v2977_v0  ;;  %2636 = vmatpush3.bf16.msra.mxu1 %v2759_v46 }
 0x13c   :  { %2637 = vmatprep.subr.bf16.mxu1 %v2977_v0 }
 0x13f   :  { %2638 = vmatpush3.bf16.msra.mxu1 %v2760_v47  ;;  %v1025_v47 = vld [vmem:[#allocation8 + $0x240] sm:$0xff] }
 0x140   :  { %2639 = vmatprep.subr.bf16.mxu1 %v2977_v0 }
 0x143   :  { %2640 = vmatpush3.bf16.msra.mxu1 %v2761_v53 }
 0x144   :  { %2641 = vmatprep.subr.bf16.mxu1 %v2977_v0 }
 0x147   :  { %2642 = vmatpush3.bf16.msra.mxu1 %v2762_v54 }
 0x148   :  { %2666 = vmatprep.subr.mxu1 %v2977_v0 }
 0x20d   :  { %v301_v39 = vpop.f32.mrb[0].mxu1 }
 0x20e   :  { %v305_v40 = vmul.f32 0.0625, %v301_v39  ;;  %v2605_v41 = vpop.f32.mrb[1].mxu1  ;;  %v1001_v39 = vld [vmem:[#allocation8 + $0x180] sm:$0xff] }
 0x20f   :  { %v1002_v41 = vld [vmem:[#allocation8 + $0x188] sm:$0xff] }
 0x210   :  { %2609 = vmatmul.mubr.msk.f32.vlgmr.msra.gmra.mrb[4].mxu0 %vm306_vm9, %v305_v40  ;;  %v1013_v40 = vld [vmem:[#allocation8 + $0x1e0] sm:$0xff] }
 0x211   :  { %2709 = vmatpush3.bf16.msk.msra.mxu0 %vm3114_vm8, %v2980_v16  ;;  %2627 = vmatprep.mubr.msk.f32.mxu0 %vm2978_vm0, %v2977_v0 }
 0x212   :  { %2710 = vmatprep.subr.bf16.mxu0 %v2979_v12 }
 0x215   :  { %2712 = vmatpush3.bf16.msk.msra.mxu0 %vm3124_vm15, %v2980_v16 }
 0x216   :  { %2713 = vmatprep.subr.bf16.mxu0 %v2979_v12 }
 0x219   :  { %2715 = vmatpush3.bf16.msk.msra.mxu0 %vm3134_vm7, %v2980_v16 }
 0x21a   :  { %2716 = vmatprep.subr.bf16.mxu0 %v2979_v12 }
 0x21d   :  { %2718 = vmatpush3.bf16.msk.msra.mxu0 %vm3142_vm1, %v2980_v16 }
 0x21e   :  { %2630 = vmatprep.subr.mxu0 %v2977_v0 }
 0x2e3   :  { %v380_v42 = vpop.f32.mrb[4].mxu0 }
 0x2e4   :  { %v384_v43 = vsub.f32 %v166_v38, %v380_v42  ;;  %v2610_v44 = vpop.f32.mrb[5].mxu0  ;;  %v2427_v38 = vcombine.low %v977_v34, %v989_v35  ;;  %v2452_v42 = vcombine.high %v1001_v39, %v1013_v40  ;;  %v970_v34 = vld [vmem:[#allocation8 + $0x88] sm:$0xff] }
 0x2e5   :  { %v2451_v44 = vcombine.low %v1001_v39, %v1013_v40  ;;  %v981_v39 = vld [vmem:[#allocation8 + $0xe0] sm:$0xff] }
 0x2e6   :  { %v385_v45 = vmul.f32 %v384_v43, %v384_v43  ;;  %v993_v40 = vld [vmem:[#allocation8 + $0x140] sm:$0xff] }
 0x2e8   :  { %2628 = vmatmul.mubr.msk.f32.vlgmr.msra.gmra.mrb[6].mxu0 %vm231_vm6, %v385_v45 }
 0x2e9   :  { %2631 = vmatpush3.msk.msra.mxu0 %vm310_vm4, %v3153_v27  ;;  %2632 = vmatprep.mubr.msk.f32.mxu0 %vm2978_vm0, %v2977_v0 }
 0x2ea   :  { %2719 = vmatprep.subr.bf16.mxu0 %v2979_v12 }
 0x3bb   :  { %v455_v48 = vpop.f32.mrb[6].mxu0 }
 0x3bc   :  { %v459_v49 = vmul.f32 0.0625, %v455_v48  ;;  %v2629_v50 = vpop.f32.mrb[7].mxu0  ;;  %v1037_v48 = vld [vmem:[#allocation8 + $0x2a0] sm:$0xff] }
 0x3bd   :  { %v2476_v50 = vcombine.high %v1025_v47, %v1037_v48 }
 0x3be   :  { %v460_v51 = vadd.f32 1e-05, %v459_v49  ;;  %v1026_v49 = vld [vmem:[#allocation8 + $0x248] sm:$0xff] }
 0x3c0   :  { %2765 = vrsqrt.f32 %v460_v51  ;;  %v1038_v51 = vld [vmem:[#allocation8 + $0x2a8] sm:$0xff] }
 0x3c1   :  { %v2477_v53 = vcombine.low %v1026_v49, %v1038_v51  ;;  %v2478_v54 = vcombine.high %v1026_v49, %v1038_v51  ;;  %v1006_v49 = vld [vmem:[#allocation8 + $0x1a8] sm:$0xff]  ;;  %v2435_v51 = vcombine.low %v981_v39, %v993_v40 }
 0x3ca   :  { %v2766_v52 = vpop.eup %2765 }
 0x3cb   :  { %2633 = vmatmul.mubr.msk.f32.vlgmr.msra.gmra.mrb[8].mxu0 %vm306_vm9, %v2766_v52  ;;  %v2475_v52 = vcombine.low %v1025_v47, %v1037_v48  ;;  %v1005_v47 = vld [vmem:[#allocation8 + $0x1a0] sm:$0xff] }
 0x3cc   :  { %2721 = vmatpush3.bf16.msk.msra.mxu0 %vm3114_vm8, %v2980_v16  ;;  %2663 = vmatprep.mubr.msk.f32.mxu0 %vm2978_vm0, %v2977_v0  ;;  %v1017_v48 = vld [vmem:[#allocation8 + $0x200] sm:$0xff] }
 0x3cd   :  { %2722 = vmatprep.subr.bf16.mxu0 %v2979_v12 }
 0x3d0   :  { %2724 = vmatpush3.bf16.msk.msra.mxu0 %vm3124_vm15, %v2980_v16 }
 0x3d1   :  { %2725 = vmatprep.subr.bf16.mxu0 %v2979_v12 }
 0x3d4   :  { %2727 = vmatpush3.bf16.msk.msra.mxu0 %vm3134_vm7, %v2980_v16 }
 0x3d5   :  { %2728 = vmatprep.subr.bf16.mxu0 %v2979_v12 }
 0x3d8   :  { %2730 = vmatpush3.bf16.msk.msra.mxu0 %vm3142_vm1, %v2980_v16 }
 0x3d9   :  { %2690 = vmatprep.subr.mxu0 %v2977_v0 }
 0x49e   :  { %v531_v56 = vpop.f32.mrb[8].mxu0 }
 0x49f   :  { %v535_v57 = vmul.f32 %v531_v56, %v384_v43  ;;  %v2634_v58 = vpop.f32.mrb[9].mxu0  ;;  %v1014_v43 = vld [vmem:[#allocation8 + $0x1e8] sm:$0xff]  ;;  %v967_v56 = vld [vmem:[#allocation8 + $0x70] sm:$0xff] }
 0x4a0   :  { %v2453_v45 = vcombine.low %v1002_v41, %v1014_v43  ;;  %v2454_v46 = vcombine.high %v1002_v41, %v1014_v43  ;;  %v982_v41 = vld [vmem:[#allocation8 + $0xe8] sm:$0xff] }
 0x4a1   :  { %v542_v60 = vmul.f32 %v2371_v55, %v535_v57  ;;  %v955_v55 = vld [vmem:[#allocation8 + $0x10] sm:$0xff]  ;;  %v956_v57 = vld [vmem:[#allocation8 + $0x18] sm:$0xff] }
 0x4a2   :  { %v2408_v58 = vcombine.high %v955_v55, %v967_v56 }
 0x4a3   :  { %v549_v61 = vadd.f32 %v2372_v59, %v542_v60  ;;  %v968_v59 = vld [vmem:[#allocation8 + $0x78] sm:$0xff]  ;;  %v2407_v60 = vcombine.low %v955_v55, %v967_v56  ;;  %v1029_v55 = vld [vmem:[#allocation8 + $0x260] sm:$0xff] }
 0x4a4   :  { %v1041_v56 = vld [vmem:[#allocation8 + $0x2c0] sm:$0xff] }
 0x4a5   :  { %v558_v62 = vpack.c.bf16 %v549_v61, %v549_v61  ;;  %v2409_v61 = vcombine.low %v956_v57, %v968_v59 }
 0x4a7   :  { %2644 = vmatmul.mubr.msk.bf16.vlgmr.msra.gmra.mrb[4].mxu1 %vm231_vm6, %v558_v62  ;;  %v2410_v62 = vcombine.high %v956_v57, %v968_v59  ;;  %v1030_v57 = vld [vmem:[#allocation8 + $0x268] sm:$0xff]  ;;  %v2459_v59 = vcombine.low %v1005_v47, %v1017_v48 }
 0x4a8   :  { %2667 = vmatpush3.msk.msra.mxu1 %vm310_vm4, %v3153_v27  ;;  %2668 = vmatprep.mubr.msk.f32.mxu1 %vm2978_vm0, %v2977_v0 }
 0x4a9   :  { %2731 = vmatprep.subr.bf16.mxu1 %v2979_v12 }
 0x57a   :  { %v627_v1 = vpop.f32.mrb[4].mxu1 }
 0x57b   :  { %v628_v2 = vadd.f32 %v2373_v63, %v627_v1  ;;  %v2645_v3 = vpop.f32.mrb[5].mxu1  ;;  %v2981_v63 = vmov 0   ;;  %v2401_v1 = vld [vmem:[%s3397_s7] ss:$0 sm:$0xff] }
 0x57c   :  { %v630_v4 = vpop.f32.mrb[6].mxu1 }
 0x57d   :  { %v634_v5 = vmul.f32 0.70710677, %v628_v2  ;;  %v2646_v6 = vpop.f32.mrb[7].mxu1  ;;  %v633_v9 = vmul.f32 0.5, %v628_v2 }
 0x57f   :  { %2767 = verf.f32 %v634_v5  ;;  %v2402_v5 = vld [vmem:[%s3398_s8] ss:$0 sm:$0xff] }
 0x589   :  { %v2768_v8 = vpop.eup %2767 }
 0x58a   :  { %v636_v10 = vadd.f32 1.0, %v2768_v8  ;;  %v979_v8 = vld [vmem:[#allocation8 + $0xd0] sm:$0xff] }
 0x58c   :  { %v637_v11 = vmul.f32 %v636_v10, %v633_v9  ;;  %v991_v9 = vld [vmem:[#allocation8 + $0x130] sm:$0xff]  ;;  %v980_v10 = vld [vmem:[#allocation8 + $0xd8] sm:$0xff] }
 0x58e   :  { %2664 = vmatmul.mubr.msk.f32.vlgmr.msra.gmra.mrb[10].mxu0 %vm231_vm6, %v637_v11 }
 0x58f   :  { %2691 = vmatpush3.msk.msra.mxu0 %vm310_vm4, %v3153_v27  ;;  %2692 = vmatprep.mubr.msk.f32.mxu0 %vm2978_vm0, %v2977_v0  ;;  %v2406_v27 = vcombine.high %v954_v24, %v966_v26 }
 0x590   :  { %1659 = vmatprep.subr.bf16.mxu0 %v2404_v25  ;;  %v2458_v25 = vcombine.high %v1004_v20, %v1016_v21 }
 0x661   :  { %v709_v13 = vpop.f32.mrb[10].mxu0 }
 0x662   :  { %v713_v14 = vmul.f32 0.0625, %v709_v13  ;;  %v2665_v17 = vpop.f32.mrb[11].mxu0 }
 0x663   :  { %v2432_v17 = vcombine.high %v979_v8, %v991_v9 }
 0x664   :  { %2669 = vmatmul.mubr.msk.f32.vlgmr.msra.gmra.mrb[2].mxu1 %vm306_vm9, %v713_v14 }
 0x665   :  { %2733 = vmatpush3.bf16.msk.msra.mxu1 %vm3114_vm8, %v2980_v16  ;;  %2687 = vmatprep.mubr.msk.f32.mxu1 %vm2978_vm0, %v2977_v0 }
 0x666   :  { %2734 = vmatprep.subr.bf16.mxu1 %v2979_v12 }
 0x669   :  { %2736 = vmatpush3.bf16.msk.msra.mxu1 %vm3124_vm15, %v2980_v16 }
 0x66a   :  { %2737 = vmatprep.subr.bf16.mxu1 %v2979_v12 }
 0x66d   :  { %2739 = vmatpush3.bf16.msk.msra.mxu1 %vm3134_vm7, %v2980_v16 }
 0x66e   :  { %2740 = vmatprep.subr.bf16.mxu1 %v2979_v12  ;;  %v2405_v12 = vcombine.low %v954_v24, %v966_v26  ;;  %v1027_v26 = vld [vmem:[#allocation8 + $0x250] sm:$0xff] }
 0x671   :  { %2742 = vmatpush3.bf16.msk.msra.mxu1 %vm3142_vm1, %v2980_v16  ;;  %v2430_v16 = vcombine.high %v978_v28, %v990_v23  ;;  %v1040_v28 = vld [vmem:[#allocation8 + $0x2b8] sm:$0xff] }
 0x672   :  { %1700 = vmatprep.subr.bf16.mxu1 %v2406_v27  ;;  %v1028_v27 = vld [vmem:[#allocation8 + $0x258] sm:$0xff] }
 0x737   :  { %v783_v15 = vpop.f32.mrb[2].mxu1 }
 0x738   :  { %v3250_v0 = vsub.f32 %v637_v11, %v783_v15  ;;  %v2670_v18 = vpop.f32.mrb[3].mxu1  ;;  %v992_v11 = vld [vmem:[#allocation8 + $0x138] sm:$0xff] }
 0x739   :  { %v2434_v15 = vcombine.high %v980_v10, %v992_v11  ;;  %v1003_v18 = vld [vmem:[#allocation8 + $0x190] sm:$0xff]  ;;  %v2433_v24 = vcombine.low %v980_v10, %v992_v11 }
 0x73a   :  { %v788_v19 = vmul.f32 %v3250_v0, %v3250_v0  ;;  %v983_v10 = vld [vmem:[#allocation8 + $0xf0] sm:$0xff] }
 0x73b   :  { %v995_v11 = vld [vmem:[#allocation8 + $0x150] sm:$0xff] }
 0x73c   :  { %2688 = vmatmul.mubr.msk.f32.vlgmr.msra.gmra.mrb[8].mxu1 %vm231_vm6, %v788_v19  ;;  %v1015_v19 = vld [vmem:[#allocation8 + $0x1f0] sm:$0xff] }
 0x73d   :  { %1701 = vmatpush1.bf16.msra.mxu1 %v2405_v12  ;;  %1732 = vmatprep.mubr.bf16.mxu1 %v2981_v63  ;;  %v1039_v12 = vld [vmem:[#allocation8 + $0x2b0] sm:$0xff]  ;;  %v2455_v23 = vcombine.low %v1003_v18, %v1015_v19 }
 0x73e   :  { %1702 = vmatprep.subr.bf16.mxu1 %v2430_v16  ;;  %v2457_v16 = vcombine.low %v1004_v20, %v1016_v21  ;;  %v2479_v35 = vcombine.low %v1027_v26, %v1039_v12  ;;  %v1007_v21 = vld [vmem:[#allocation8 + $0x1b0] sm:$0xff] }
 0x741   :  { %1703 = vmatpush1.bf16.msra.mxu1 %v2429_v29  ;;  %v2480_v29 = vcombine.high %v1027_v26, %v1039_v12 }
 0x742   :  { %1704 = vmatprep.subr.bf16.mxu1 %v2454_v46 }
 0x745   :  { %1705 = vmatpush1.bf16.msra.mxu1 %v2453_v45  ;;  %v2436_v45 = vcombine.high %v981_v39, %v993_v40 }
 0x746   :  { %1706 = vmatprep.subr.bf16.mxu1 %v2478_v54 }
 0x749   :  { %1707 = vmatpush1.bf16.msra.mxu1 %v2477_v53  ;;  %v2460_v53 = vcombine.high %v1005_v47, %v1017_v48 }
 0x74a   :  { %1782 = vmatprep.subr.bf16.mxu1 %v2410_v62 }
 0x80f   :  { %v858_v30 = vpop.f32.mrb[8].mxu1 }
 0x810   :  { %v862_v31 = vmul.f32 0.0625, %v858_v30  ;;  %v2689_v32 = vpop.f32.mrb[9].mxu1  ;;  %v2482_v30 = vcombine.high %v1028_v27, %v1040_v28 }
 0x811   :  { %v969_v32 = vld [vmem:[#allocation8 + $0x80] sm:$0xff] }
 0x812   :  { %v863_v33 = vadd.f32 1e-05, %v862_v31  ;;  %v957_v31 = vld [vmem:[#allocation8 + $0x20] sm:$0xff] }
 0x813   :  { %v2411_v43 = vcombine.low %v957_v31, %v969_v32 }
 0x814   :  { %2769 = vrsqrt.f32 %v863_v33  ;;  %v958_v33 = vld [vmem:[#allocation8 + $0x28] sm:$0xff] }
 0x81e   :  { %v2770_v37 = vpop.eup %2769 }
 0x81f   :  { %2693 = vmatmul.mubr.msk.f32.vlgmr.msra.gmra.mrb[12].mxu0 %vm306_vm9, %v2770_v37  ;;  %v2412_v37 = vcombine.high %v957_v31, %v969_v32 }
 0x820   :  { %1660 = vmatpush1.bf16.msra.mxu0 %v2403_v22  ;;  %1691 = vmatprep.mubr.bf16.mxu0 %v2981_v63  ;;  %v2456_v22 = vcombine.high %v1003_v18, %v1015_v19  ;;  %v2440_v19 = vcombine.high %v983_v10, %v995_v11 }
 0x821   :  { %1661 = vmatprep.subr.bf16.mxu0 %v2428_v36  ;;  %v2481_v36 = vcombine.low %v1028_v27, %v1040_v28  ;;  %v1031_v28 = vld [vmem:[#allocation8 + $0x270] sm:$0xff] }
 0x824   :  { %1662 = vmatpush1.bf16.msra.mxu0 %v2427_v38  ;;  %v2414_v38 = vcombine.high %v958_v33, %v970_v34 }
 0x825   :  { %1663 = vmatprep.subr.bf16.mxu0 %v2452_v42  ;;  %v994_v42 = vld [vmem:[#allocation8 + $0x148] sm:$0xff] }
 0x826   :  { %v2438_v46 = vcombine.high %v982_v41, %v994_v42 }
 0x828   :  { %1664 = vmatpush1.bf16.msra.mxu0 %v2451_v44  ;;  %v2413_v44 = vcombine.low %v958_v33, %v970_v34  ;;  %v961_v34 = vld [vmem:[#allocation8 + $0x40] sm:$0xff] }
 0x829   :  { %1665 = vmatprep.subr.bf16.mxu0 %v2476_v50  ;;  %v1018_v50 = vld [vmem:[#allocation8 + $0x208] sm:$0xff] }
 0x82a   :  { %v2462_v54 = vcombine.high %v1006_v49, %v1018_v50 }
 0x82c   :  { %1666 = vmatpush1.bf16.msra.mxu0 %v2475_v52  ;;  %v2437_v52 = vcombine.low %v982_v41, %v994_v42  ;;  %v985_v42 = vld [vmem:[#allocation8 + $0x100] sm:$0xff] }
 0x82d   :  { %1741 = vmatprep.subr.bf16.mxu0 %v2408_v58  ;;  %v1042_v58 = vld [vmem:[#allocation8 + $0x2c8] sm:$0xff] }
 0x82e   :  { %v2486_v62 = vcombine.high %v1030_v57, %v1042_v58 }
 0x8f2   :  { %v934_v2 = vpop.f32.mrb[12].mxu0 }
 0x8f3   :  { %v938_v3 = vmul.f32 %v934_v2, %v3250_v0  ;;  %v2694_v4 = vpop.f32.mrb[13].mxu0  ;;  %v2431_v0 = vcombine.low %v979_v8, %v991_v9  ;;  %v971_v2 = vld [vmem:[#allocation8 + $0x90] sm:$0xff] }
 0x8f4   :  { %v972_v4 = vld [vmem:[#allocation8 + $0x98] sm:$0xff] }
 0x8f5   :  { %v945_v6 = vmul.f32 %v2401_v1, %v938_v3  ;;  %v959_v1 = vld [vmem:[#allocation8 + $0x30] sm:$0xff]  ;;  %v960_v3 = vld [vmem:[#allocation8 + $0x38] sm:$0xff] }
 0x8f6   :  { %v2416_v8 = vcombine.high %v959_v1, %v971_v2  ;;  %v2418_v9 = vcombine.high %v960_v3, %v972_v4  ;;  %v2417_v18 = vcombine.low %v960_v3, %v972_v4  ;;  %v963_v4 = vld [vmem:[#allocation8 + $0x50] sm:$0xff] }
 0x8f7   :  { %v952_v13 = vadd.f32 %v2402_v5, %v945_v6  ;;  %v2483_v5 = vcombine.low %v1029_v55, %v1041_v56  ;;  %v2485_v6 = vcombine.low %v1030_v57, %v1042_v58  ;;  %v1033_v58 = vld [vmem:[#allocation8 + $0x280] sm:$0xff] }
 0x8f9   :  { %v3265_v14 = vpack.c.bf16 %v952_v13, %v952_v13  ;;  %v984_v13 = vld [vmem:[#allocation8 + $0xf8] sm:$0xff] }
 0x8fb   :  { %2499 = vmatmul.mubr.msk.bf16.vlgmr.msra.gmra.mrb[16].mxu0 %vm231_vm6, %v3265_v14  ;;  %2500 = vmatmul.mubr.msk.bf16.vlgmr.msra.gmra.mrb[12].mxu1 %vm231_vm6, %v3265_v14 }
 0x8fc   :  { %1742 = vmatpush1.bf16.msra.mxu0 %v2407_v60  ;;  %1783 = vmatpush1.bf16.msra.mxu1 %v2409_v61  ;;  %v2461_v60 = vcombine.low %v1006_v49, %v1018_v50  ;;  %v2484_v61 = vcombine.high %v1029_v55, %v1041_v56  ;;  %v1009_v50 = vld [vmem:[#allocation8 + $0x1c0] sm:$0xff] }
 0x8fd   :  { %1743 = vmatprep.subr.bf16.mxu0 %v2432_v17  ;;  %1784 = vmatprep.subr.bf16.mxu1 %v2434_v15  ;;  %v996_v17 = vld [vmem:[#allocation8 + $0x158] sm:$0xff]  ;;  %v2415_v15 = vcombine.low %v959_v1, %v971_v2 }
 0x8fe   :  { %1773 = vmatprep.mubr.bf16.mxu0 %v2981_v63  ;;  %1814 = vmatprep.mubr.bf16.mxu1 %v2981_v63  ;;  %v2442_v20 = vcombine.high %v984_v13, %v996_v17  ;;  %v2441_v26 = vcombine.low %v984_v13, %v996_v17  ;;  %v987_v17 = vld [vmem:[#allocation8 + $0x110] sm:$0xff] }
 0x900   :  { %1744 = vmatpush1.bf16.msra.mxu0 %v2431_v0  ;;  %1785 = vmatpush1.bf16.msra.mxu1 %v2433_v24  ;;  %v1019_v0 = vld [vmem:[#allocation8 + $0x210] sm:$0xff]  ;;  %v1008_v24 = vld [vmem:[#allocation8 + $0x1b8] sm:$0xff] }
 0x901   :  { %1745 = vmatprep.subr.bf16.mxu0 %v2456_v22  ;;  %1786 = vmatprep.subr.bf16.mxu1 %v2458_v25  ;;  %v1020_v22 = vld [vmem:[#allocation8 + $0x218] sm:$0xff]  ;;  %v2439_v25 = vcombine.low %v983_v10, %v995_v11  ;;  %v2464_v12 = vcombine.high %v1007_v21, %v1019_v0 }
 0x902   :  { %v2466_v27 = vcombine.high %v1008_v24, %v1020_v22  ;;  %v2465_v31 = vcombine.low %v1008_v24, %v1020_v22  ;;  %v1011_v22 = vld [vmem:[#allocation8 + $0x1d0] sm:$0xff] }
 0x904   :  { %1746 = vmatpush1.bf16.msra.mxu0 %v2455_v23  ;;  %1787 = vmatpush1.bf16.msra.mxu1 %v2457_v16  ;;  %v1043_v23 = vld [vmem:[#allocation8 + $0x2d0] sm:$0xff]  ;;  %v1032_v16 = vld [vmem:[#allocation8 + $0x278] sm:$0xff] }
 0x905   :  { %1747 = vmatprep.subr.bf16.mxu0 %v2480_v29  ;;  %1788 = vmatprep.subr.bf16.mxu1 %v2482_v30  ;;  %v1044_v29 = vld [vmem:[#allocation8 + $0x2d8] sm:$0xff]  ;;  %v2463_v30 = vcombine.low %v1007_v21, %v1019_v0  ;;  %v2488_v32 = vcombine.high %v1031_v28, %v1043_v23 }
 0x906   :  { %v2490_v33 = vcombine.high %v1032_v16, %v1044_v29  ;;  %v2489_v39 = vcombine.low %v1032_v16, %v1044_v29  ;;  %v1035_v29 = vld [vmem:[#allocation8 + $0x290] sm:$0xff] }
 0x908   :  { %1748 = vmatpush1.bf16.msra.mxu0 %v2479_v35  ;;  %1789 = vmatpush1.bf16.msra.mxu1 %v2481_v36  ;;  %v973_v35 = vld [vmem:[#allocation8 + $0xa0] sm:$0xff]  ;;  %v962_v36 = vld [vmem:[#allocation8 + $0x48] sm:$0xff] }
 0x909   :  { %1823 = vmatprep.subr.bf16.mxu0 %v2412_v37  ;;  %1864 = vmatprep.subr.bf16.mxu1 %v2414_v38  ;;  %v974_v37 = vld [vmem:[#allocation8 + $0xa8] sm:$0xff]  ;;  %v2487_v38 = vcombine.low %v1031_v28, %v1043_v23  ;;  %v2420_v40 = vcombine.high %v961_v34, %v973_v35 }
 0x90a   :  { %v2422_v41 = vcombine.high %v962_v36, %v974_v37  ;;  %v2421_v47 = vcombine.low %v962_v36, %v974_v37 }
 0x90b   :  { %2501 = vmatmul.mubr.msk.bf16.vlgmr.msra.gmra.mrb[20].mxu0 %vm231_vm6, %v3265_v14  ;;  %2502 = vmatmul.mubr.msk.bf16.vlgmr.msra.gmra.mrb[16].mxu1 %vm231_vm6, %v3265_v14 }
 0x90c   :  { %1824 = vmatpush1.bf16.msra.mxu0 %v2411_v43  ;;  %1865 = vmatpush1.bf16.msra.mxu1 %v2413_v44  ;;  %v997_v43 = vld [vmem:[#allocation8 + $0x160] sm:$0xff]  ;;  %v986_v44 = vld [vmem:[#allocation8 + $0x108] sm:$0xff] }
 0x90d   :  { %1825 = vmatprep.subr.bf16.mxu0 %v2436_v45  ;;  %1866 = vmatprep.subr.bf16.mxu1 %v2438_v46  ;;  %v998_v45 = vld [vmem:[#allocation8 + $0x168] sm:$0xff]  ;;  %v2419_v46 = vcombine.low %v961_v34, %v973_v35  ;;  %v2444_v48 = vcombine.high %v985_v42, %v997_v43 }
 0x90e   :  { %1855 = vmatprep.mubr.bf16.mxu0 %v2981_v63  ;;  %1896 = vmatprep.mubr.bf16.mxu1 %v2981_v63  ;;  %v2446_v49 = vcombine.high %v986_v44, %v998_v45  ;;  %v2445_v55 = vcombine.low %v986_v44, %v998_v45 }
 0x910   :  { %1826 = vmatpush1.bf16.msra.mxu0 %v2435_v51  ;;  %1867 = vmatpush1.bf16.msra.mxu1 %v2437_v52  ;;  %v1021_v51 = vld [vmem:[#allocation8 + $0x220] sm:$0xff]  ;;  %v1010_v52 = vld [vmem:[#allocation8 + $0x1c8] sm:$0xff] }
 0x911   :  { %1827 = vmatprep.subr.bf16.mxu0 %v2460_v53  ;;  %1868 = vmatprep.subr.bf16.mxu1 %v2462_v54  ;;  %v1022_v53 = vld [vmem:[#allocation8 + $0x228] sm:$0xff]  ;;  %v2443_v54 = vcombine.low %v985_v42, %v997_v43  ;;  %v2468_v56 = vcombine.high %v1009_v50, %v1021_v51  ;;  %v3314_v42 = vsub.s32 3, %v3106_v7 }
 0x912   :  { %v2470_v57 = vcombine.high %v1010_v52, %v1022_v53  ;;  %v2469_v1 = vcombine.low %v1010_v52, %v1022_v53 }
 0x914   :  { %1828 = vmatpush1.bf16.msra.mxu0 %v2459_v59  ;;  %1869 = vmatpush1.bf16.msra.mxu1 %v2461_v60  ;;  %v1045_v59 = vld [vmem:[#allocation8 + $0x2e0] sm:$0xff]  ;;  %v1034_v60 = vld [vmem:[#allocation8 + $0x288] sm:$0xff] }
 0x915   :  { %1829 = vmatprep.subr.bf16.mxu0 %v2484_v61  ;;  %1870 = vmatprep.subr.bf16.mxu1 %v2486_v62  ;;  %v1046_v61 = vld [vmem:[#allocation8 + $0x2e8] sm:$0xff]  ;;  %v2467_v62 = vcombine.low %v1009_v50, %v1021_v51  ;;  %v2492_v2 = vcombine.high %v1033_v58, %v1045_v59 }
 0x916   :  { %v2494_v3 = vcombine.high %v1034_v60, %v1046_v61  ;;  %v2493_v10 = vcombine.low %v1034_v60, %v1046_v61 }
 0x918   :  { %1830 = vmatpush1.bf16.msra.mxu0 %v2483_v5  ;;  %1871 = vmatpush1.bf16.msra.mxu1 %v2485_v6  ;;  %v975_v5 = vld [vmem:[#allocation8 + $0xb0] sm:$0xff]  ;;  %v964_v6 = vld [vmem:[#allocation8 + $0x58] sm:$0xff] }
 0x919   :  { %1905 = vmatprep.subr.bf16.mxu0 %v2416_v8  ;;  %1946 = vmatprep.subr.bf16.mxu1 %v2418_v9  ;;  %v976_v8 = vld [vmem:[#allocation8 + $0xb8] sm:$0xff]  ;;  %v2491_v9 = vcombine.low %v1033_v58, %v1045_v59  ;;  %v2424_v11 = vcombine.high %v963_v4, %v975_v5 }
 0x91a   :  { %v2426_v13 = vcombine.high %v964_v6, %v976_v8  ;;  %v2425_v21 = vcombine.low %v964_v6, %v976_v8 }
 0x91b   :  { %2503 = vmatmul.mubr.msk.bf16.vlgmr.msra.gmra.mrb[24].mxu0 %vm231_vm6, %v3265_v14  ;;  %2504 = vmatmul.mubr.msk.bf16.vlgmr.msra.gmra.mrb[20].mxu1 %vm231_vm6, %v3265_v14 }
 0x91c   :  { %1906 = vmatpush1.bf16.msra.mxu0 %v2415_v15  ;;  %1947 = vmatpush1.bf16.msra.mxu1 %v2417_v18  ;;  %v999_v15 = vld [vmem:[#allocation8 + $0x170] sm:$0xff]  ;;  %v988_v18 = vld [vmem:[#allocation8 + $0x118] sm:$0xff] }
 0x91d   :  { %1907 = vmatprep.subr.bf16.mxu0 %v2440_v19  ;;  %1948 = vmatprep.subr.bf16.mxu1 %v2442_v20  ;;  %v1000_v19 = vld [vmem:[#allocation8 + $0x178] sm:$0xff]  ;;  %v2423_v20 = vcombine.low %v963_v4, %v975_v5  ;;  %v2448_v0 = vcombine.high %v987_v17, %v999_v15 }
 0x91e   :  { %1937 = vmatprep.mubr.bf16.mxu0 %v2981_v63  ;;  %1978 = vmatprep.mubr.bf16.mxu1 %v2981_v63  ;;  %v2450_v24 = vcombine.high %v988_v18, %v1000_v19  ;;  %v2449_v28 = vcombine.low %v988_v18, %v1000_v19 }
 0x920   :  { %1908 = vmatpush1.bf16.msra.mxu0 %v2439_v25  ;;  %1949 = vmatpush1.bf16.msra.mxu1 %v2441_v26  ;;  %v1023_v25 = vld [vmem:[#allocation8 + $0x230] sm:$0xff]  ;;  %v1012_v26 = vld [vmem:[#allocation8 + $0x1d8] sm:$0xff] }
 0x921   :  { %1909 = vmatprep.subr.bf16.mxu0 %v2464_v12  ;;  %1950 = vmatprep.subr.bf16.mxu1 %v2466_v27  ;;  %v1024_v12 = vld [vmem:[#allocation8 + $0x238] sm:$0xff]  ;;  %v2447_v27 = vcombine.low %v987_v17, %v999_v15  ;;  %v2472_v23 = vcombine.high %v1011_v22, %v1023_v25 }
 0x922   :  { %v2474_v16 = vcombine.high %v1012_v26, %v1024_v12  ;;  %v2473_v34 = vcombine.low %v1012_v26, %v1024_v12 }
 0x924   :  { %1910 = vmatpush1.bf16.msra.mxu0 %v2463_v30  ;;  %1951 = vmatpush1.bf16.msra.mxu1 %v2465_v31  ;;  %v1047_v30 = vld [vmem:[#allocation8 + $0x2f0] sm:$0xff]  ;;  %v1036_v31 = vld [vmem:[#allocation8 + $0x298] sm:$0xff] }
 0x925   :  { %1911 = vmatprep.subr.bf16.mxu0 %v2488_v32  ;;  %1952 = vmatprep.subr.bf16.mxu1 %v2490_v33  ;;  %v1048_v32 = vld [vmem:[#allocation8 + $0x2f8] sm:$0xff]  ;;  %v2471_v33 = vcombine.low %v1011_v22, %v1023_v25  ;;  %v2496_v35 = vcombine.high %v1035_v29, %v1047_v30  ;;  %v2495_v37 = vcombine.low %v1035_v29, %v1047_v30 }
 0x926   :  { %v2498_v36 = vcombine.high %v1036_v31, %v1048_v32 }
 0x928   :  { %1912 = vmatpush1.bf16.msra.mxu0 %v2487_v38  ;;  %1953 = vmatpush1.bf16.msra.mxu1 %v2489_v39  ;;  %v2497_v38 = vcombine.low %v1036_v31, %v1048_v32  ;;  %v3305_v39 = vsub.s32 2, %v3106_v7  ;;  %v3339_v32 = vld [vmem:[%s3400_s10 + $0x8] sm:$0xff] }
 0x929   :  { %1987 = vmatprep.subr.bf16.mxu0 %v2420_v40  ;;  %2028 = vmatprep.subr.bf16.mxu1 %v2422_v41  ;;  %v1050_v40 = vld [vmem:[%s3400_s10] sm:$0xff]  ;;  %v3311_v41 = vsub.s32 1, %v3106_v7 }
 0x92a   :  { %v1071_v45 = vrot.slane %v1050_v40, %v3314_v42 }
 0x92b   :  { %2505 = vmatmul.mubr.msk.bf16.vlgmr.msra.gmra.mrb[28].mxu0 %vm231_vm6, %v3265_v14  ;;  %2506 = vmatmul.mubr.msk.bf16.vlgmr.msra.gmra.mrb[24].mxu1 %vm231_vm6, %v3265_v14  ;;  %v1063_v44 = vrot.slane %v1050_v40, %v3311_v41 }
 0x92c   :  { %1988 = vmatpush1.bf16.msra.mxu0 %v2419_v46  ;;  %2029 = vmatpush1.bf16.msra.mxu1 %v2421_v47 }
 0x92d   :  { %1989 = vmatprep.subr.bf16.mxu0 %v2444_v48  ;;  %2030 = vmatprep.subr.bf16.mxu1 %v2446_v49 }
 0x92e   :  { %2019 = vmatprep.mubr.bf16.mxu0 %v2981_v63  ;;  %2060 = vmatprep.mubr.bf16.mxu1 %v2981_v63 }
 0x930   :  { %1990 = vmatpush1.bf16.msra.mxu0 %v2443_v54  ;;  %2031 = vmatpush1.bf16.msra.mxu1 %v2445_v55 }
 0x931   :  { %1991 = vmatprep.subr.bf16.mxu0 %v2468_v56  ;;  %2032 = vmatprep.subr.bf16.mxu1 %v2470_v57 }
 0x934   :  { %1992 = vmatpush1.bf16.msra.mxu0 %v2467_v62  ;;  %2033 = vmatpush1.bf16.msra.mxu1 %v2469_v1  ;;  %v3321_v62 = vsub.s32 4, %v3106_v7  ;;  %v3324_v1 = vsub.s32 6, %v3106_v7 }
 0x935   :  { %1993 = vmatprep.subr.bf16.mxu0 %v2492_v2  ;;  %2034 = vmatprep.subr.bf16.mxu1 %v2494_v3  ;;  %v3327_v2 = vsub.s32 5, %v3106_v7  ;;  %v3330_v3 = vsub.s32 7, %v3106_v7 }
 0x936   :  { %v1075_v4 = vrot.slane %v1050_v40, %v3321_v62  ;;  %v1083_v5 = vrot.slane %v1050_v40, %v3324_v1 }
 0x937   :  { %v1079_v6 = vrot.slane %v1050_v40, %v3327_v2  ;;  %v1087_v8 = vrot.slane %v1050_v40, %v3330_v3 }
 0x938   :  { %1994 = vmatpush1.bf16.msra.mxu0 %v2491_v9  ;;  %2035 = vmatpush1.bf16.msra.mxu1 %v2493_v10 }
 0x939   :  { %2069 = vmatprep.subr.bf16.mxu0 %v2424_v11  ;;  %2110 = vmatprep.subr.bf16.mxu1 %v2426_v13 }
 0x93b   :  { %2507 = vmatmul.mubr.msk.bf16.vlgmr.msra.gmra.mrb[32].mxu0 %vm231_vm6, %v3265_v14  ;;  %2508 = vmatmul.mubr.msk.bf16.vlgmr.msra.gmra.mrb[28].mxu1 %vm231_vm6, %v3265_v14 }
 0x93c   :  { %2070 = vmatpush1.bf16.msra.mxu0 %v2423_v20  ;;  %2111 = vmatpush1.bf16.msra.mxu1 %v2425_v21 }
 0x93d   :  { %2071 = vmatprep.subr.bf16.mxu0 %v2448_v0  ;;  %2112 = vmatprep.subr.bf16.mxu1 %v2450_v24 }
 0x93e   :  { %2101 = vmatprep.mubr.bf16.mxu0 %v2981_v63  ;;  %2142 = vmatprep.mubr.bf16.mxu1 %v2981_v63  ;;  %v3302_v63 = vsub.s32 0, %v3106_v7 }
 0x940   :  { %2072 = vmatpush1.bf16.msra.mxu0 %v2447_v27  ;;  %2113 = vmatpush1.bf16.msra.mxu1 %v2449_v28  ;;  %v1059_v43 = vrot.slane %v1050_v40, %v3302_v63 }
 0x941   :  { %2073 = vmatprep.subr.bf16.mxu0 %v2472_v23  ;;  %2114 = vmatprep.subr.bf16.mxu1 %v2474_v16 }
 0x944   :  { %2074 = vmatpush1.bf16.msra.mxu0 %v2471_v33  ;;  %2115 = vmatpush1.bf16.msra.mxu1 %v2473_v34 }
 0x945   :  { %2075 = vmatprep.subr.bf16.mxu0 %v2496_v35  ;;  %2116 = vmatprep.subr.bf16.mxu1 %v2498_v36  ;;  %v1091_v36 = vrot.slane %v3339_v32, %v3302_v63 }
 0x948   :  { %2076 = vmatpush1.bf16.msra.mxu0 %v2495_v37  ;;  %2117 = vmatpush1.bf16.msra.mxu1 %v2497_v38  ;;  %v1099_v37 = vrot.slane %v3339_v32, %v3305_v39 }
 0x94b   :  { %2509 = vmatmul.mubr.msk.bf16.vlgmr.msra.gmra.mrb[36].mxu0 %vm231_vm6, %v3265_v14  ;;  %2510 = vmatmul.mubr.msk.bf16.vlgmr.msra.gmra.mrb[32].mxu1 %vm231_vm6, %v3265_v14  ;;  %v1067_v14 = vrot.slane %v1050_v40, %v3305_v39 }
 0x9ce   :  { %v1693_v46 = vpop.f32.mrb[16].mxu0  ;;  %v1734_v47 = vpop.f32.mrb[12].mxu1 }
 0x9cf   :  { %v1694_v48 = vadd.f32 %v1693_v46, %v1059_v43  ;;  %v1735_v49 = vadd.f32 %v1734_v47, %v1067_v14  ;;  %v1695_v50 = vpop.f32.mrb[17].mxu0  ;;  %v1736_v51 = vpop.f32.mrb[13].mxu1  ;;  %v1095_v43 = vrot.slane %v3339_v32, %v3311_v41  ;;  %v1103_v14 = vrot.slane %v3339_v32, %v3314_v42 }
 0x9d0   :  { %v1696_v52 = vadd.f32 %v1695_v50, %v1063_v44  ;;  %v1737_v53 = vadd.f32 %v1736_v51, %v1071_v45  ;;  %v1697_v54 = vpop.f32.mrb[18].mxu0  ;;  %v1738_v55 = vpop.f32.mrb[14].mxu1 }
 0x9d1   :  { %v2511_v56 = vmul.f32 -1.442695, %v1694_v48  ;;  %v2513_v57 = vmul.f32 -1.442695, %v1735_v49  ;;  %v1698_v58 = vpop.f32.mrb[19].mxu0  ;;  %v1739_v59 = vpop.f32.mrb[15].mxu1 }
 0x9d2   :  { %v2512_v60 = vmul.f32 -1.442695, %v1696_v52  ;;  %v2514_v61 = vmul.f32 -1.442695, %v1737_v53 }
 0x9d3   :  { %2771 = vpow2.f32 %v2511_v56 }
 0x9d4   :  { %2773 = vpow2.f32 %v2513_v57 }
 0x9d5   :  { %2775 = vpow2.f32 %v2512_v60 }
 0x9d6   :  { %2777 = vpow2.f32 %v2514_v61 }
 0x9dd   :  { %v2772_v9 = vpop.eup %2771 }
 0x9de   :  { %v2774_v10 = vpop.eup %2773  ;;  %v2175_v11 = vadd.f32 1.0, %v2772_v9  ;;  %v1775_v13 = vpop.f32.mrb[20].mxu0 }
 0x9df   :  { %v1816_v17 = vpop.f32.mrb[16].mxu1  ;;  %v2776_v15 = vpop.eup %2775  ;;  %v2177_v18 = vadd.f32 1.0, %v2774_v10  ;;  %v1776_v19 = vadd.f32 %v1775_v13, %v1075_v4 }
 0x9e0   :  { %v1817_v20 = vadd.f32 %v1816_v17, %v1083_v5  ;;  %v1777_v21 = vpop.f32.mrb[21].mxu0  ;;  %v1818_v7 = vpop.f32.mrb[17].mxu1  ;;  %2779 = vrcp.f32 %v2175_v11  ;;  %v2176_v24 = vadd.f32 1.0, %v2776_v15 }
 0x9e1   :  { %v2778_v0 = vpop.eup %2777  ;;  %v1778_v22 = vadd.f32 %v1777_v21, %v1079_v6  ;;  %v1819_v25 = vadd.f32 %v1818_v7, %v1087_v8  ;;  %v1779_v26 = vpop.f32.mrb[22].mxu0  ;;  %2781 = vrcp.f32 %v2177_v18  ;;  %v2515_v28 = vmul.f32 -1.442695, %v1776_v19 }
 0x9e2   :  { %v1820_v12 = vpop.f32.mrb[18].mxu1  ;;  %v2178_v27 = vadd.f32 1.0, %v2778_v0  ;;  %v2517_v23 = vmul.f32 -1.442695, %v1817_v20  ;;  %v1780_v16 = vpop.f32.mrb[23].mxu0  ;;  %2783 = vrcp.f32 %v2176_v24  ;;  %v1107_v18 = vrot.slane %v3339_v32, %v3321_v62 }
 0x9e3   :  { %v2516_v29 = vmul.f32 -1.442695, %v1778_v22  ;;  %v1821_v30 = vpop.f32.mrb[19].mxu1  ;;  %v2518_v31 = vmul.f32 -1.442695, %v1819_v25  ;;  %v1115_v19 = vrot.slane %v3339_v32, %v3324_v1  ;;  %v1111_v7 = vrot.slane %v3339_v32, %v3327_v2 }
 0x9e4   :  { %2785 = vrcp.f32 %v2178_v27  ;;  %v1119_v22 = vrot.slane %v3339_v32, %v3330_v3 }
 0x9e5   :  { %2787 = vpow2.f32 %v2515_v28 }
 0x9e6   :  { %2789 = vpow2.f32 %v2517_v23 }
 0x9e7   :  { %2791 = vpow2.f32 %v2516_v29 }
 0x9e8   :  { %2793 = vpow2.f32 %v2518_v31 }
 0x9ea   :  { %v2780_v33 = vpop.eup %2779 }
 0x9eb   :  { %v2782_v34 = vpop.eup %2781  ;;  %v2199_v35 = vadd.f32 1.0, %v2780_v33 }
 0x9ec   :  { %v2784_v38 = vpop.eup %2783  ;;  %v2201_v40 = vadd.f32 1.0, %v2782_v34 }
 0x9ed   :  { %2207 = vst [vmem:[#allocation10] sm:$0xff] %v2199_v35  ;;  %v2200_v45 = vadd.f32 1.0, %v2784_v38 }
 0x9ee   :  { %v2786_v44 = vpop.eup %2785  ;;  %2209 = vst [vmem:[#allocation10 + $0x10] sm:$0xff] %v2201_v40  ;;  %v1857_v48 = vpop.f32.mrb[24].mxu0 }
 0x9ef   :  { %v2788_v46 = vpop.eup %2787  ;;  %v2202_v47 = vadd.f32 1.0, %v2786_v44  ;;  %v1898_v49 = vpop.f32.mrb[20].mxu1  ;;  %2208 = vst [vmem:[#allocation10 + $0x8] sm:$0xff] %v2200_v45  ;;  %v1858_v52 = vadd.f32 %v1857_v48, %v1091_v36 }
 0x9f0   :  { %v2790_v50 = vpop.eup %2789  ;;  %v2179_v51 = vadd.f32 1.0, %v2788_v46  ;;  %v1899_v53 = vadd.f32 %v1898_v49, %v1099_v37  ;;  %v1859_v54 = vpop.f32.mrb[25].mxu0 }
 0x9f1   :  { %v1900_v55 = vpop.f32.mrb[21].mxu1  ;;  %v2792_v56 = vpop.eup %2791  ;;  %2210 = vst [vmem:[#allocation10 + $0x18] sm:$0xff] %v2202_v47  ;;  %v2181_v57 = vadd.f32 1.0, %v2790_v50  ;;  %v1860_v58 = vadd.f32 %v1859_v54, %v1095_v43  ;;  %v2519_v6 = vmul.f32 -1.442695, %v1858_v52 }
 0x9f2   :  { %v1901_v59 = vadd.f32 %v1900_v55, %v1103_v14  ;;  %v1861_v60 = vpop.f32.mrb[26].mxu0  ;;  %v1902_v61 = vpop.f32.mrb[22].mxu1  ;;  %2795 = vrcp.f32 %v2179_v51  ;;  %v2180_v5 = vadd.f32 1.0, %v2792_v56  ;;  %v2521_v10 = vmul.f32 -1.442695, %v1899_v53  ;;  %v3360_v51 = vld [vmem:[%s3400_s10 + $0x10] sm:$0xff] }
 0x9f3   :  { %v2794_v4 = vpop.eup %2793  ;;  %v1862_v8 = vpop.f32.mrb[27].mxu0  ;;  %2797 = vrcp.f32 %v2181_v57  ;;  %v2520_v13 = vmul.f32 -1.442695, %v1860_v58  ;;  %v1123_v52 = vrot.slane %v3360_v51, %v3302_v63  ;;  %v1131_v54 = vrot.slane %v3360_v51, %v3305_v39  ;;  %s2982_s10 = smov [#allocation10]  }
 0x9f4   :  { %v2182_v9 = vadd.f32 1.0, %v2794_v4  ;;  %v1903_v11 = vpop.f32.mrb[23].mxu1  ;;  %2799 = vrcp.f32 %v2180_v5  ;;  %v2522_v17 = vmul.f32 -1.442695, %v1901_v59  ;;  %v1127_v56 = vrot.slane %v3360_v51, %v3311_v41  ;;  %s2325_s22 = sshll.u32 %s2982_s10, 4  ;;  %s2326_s22 = int_to_ptr.vmem [resolvable:$true] %s2325_s22 }
 0x9f5   :  { %v1135_v60 = vrot.slane %v3360_v51, %v3314_v42  ;;  %s2939_s23 = scalar_lea.vmem %s2326_s22, 3072  ;;  %p2944_p5 = scmp.lt.s32.totalorder %s2326_s22, %s2326_s22 }
 0x9f6   :  { %2801 = vrcp.f32 %v2182_v9  ;;  %p2940_p4 = scmp.ne.s32.totalorder %s2326_s22, %s2939_s23  ;;  %p2945_p6 = scmp.lt.s32.totalorder %s2939_s23, %s2939_s23 }
 0x9f7   :  { %2803 = vpow2.f32 %v2519_v6 }
 0x9f8   :  { %2805 = vpow2.f32 %v2521_v10  ;;  %p2946_p7 = por %p2945_p6, %p2944_p5 }
 0x9f9   :  { %2807 = vpow2.f32 %v2520_v13 }
 0x9fa   :  { %2809 = vpow2.f32 %v2522_v17  ;;  %p2947_p8 = pnand %p2946_p7, %p2940_p4 }
 0x9fc   :  { %v2796_v15 = vpop.eup %2795 }
 0x9fd   :  { %v2798_v20 = vpop.eup %2797  ;;  %v2203_v21 = vadd.f32 1.0, %v2796_v15 }
 0x9fe   :  { %v2800_v0 = vpop.eup %2799  ;;  %v2205_v24 = vadd.f32 1.0, %v2798_v20  ;;  %v1939_v12 = vpop.f32.mrb[28].mxu0 }
 0x9ff   :  { %2211 = vst [vmem:[#allocation10 + $0x20] sm:$0xff] %v2203_v21  ;;  %v2204_v26 = vadd.f32 1.0, %v2800_v0  ;;  %v1980_v27 = vpop.f32.mrb[24].mxu1  ;;  %v1940_v16 = vadd.f32 %v1939_v12, %v1107_v18  ;;  %v1941_v30 = vpop.f32.mrb[29].mxu0  ;;  %v1143_v12 = vrot.slane %v3360_v51, %v3327_v2 }
 0xa00   :  { %v2802_v25 = vpop.eup %2801  ;;  %2213 = vst [vmem:[#allocation10 + $0x30] sm:$0xff] %v2205_v24  ;;  %v1981_v29 = vadd.f32 %v1980_v27, %v1115_v19  ;;  %v1982_v31 = vpop.f32.mrb[25].mxu1  ;;  %v1942_v35 = vadd.f32 %v1941_v30, %v1111_v7  ;;  %v1151_v27 = vrot.slane %v3360_v51, %v3330_v3 }
 0xa01   :  { %v2804_v28 = vpop.eup %2803  ;;  %v2206_v23 = vadd.f32 1.0, %v2802_v25  ;;  %2212 = vst [vmem:[#allocation10 + $0x28] sm:$0xff] %v2204_v26  ;;  %v1943_v36 = vpop.f32.mrb[30].mxu0  ;;  %v1983_v40 = vadd.f32 %v1982_v31, %v1119_v22  ;;  %v2523_v45 = vmul.f32 -1.442695, %v1940_v16  ;;  %v1139_v25 = vrot.slane %v3360_v51, %v3321_v62 }
 0xa02   :  { %v2806_v33 = vpop.eup %2805  ;;  %v2239_v34 = vadd.f32 1.0, %v2804_v28  ;;  %v1984_v37 = vpop.f32.mrb[26].mxu1  ;;  %v2525_v48 = vmul.f32 -1.442695, %v1981_v29  ;;  %v2524_v49 = vmul.f32 -1.442695, %v1942_v35  ;;  %v1147_v26 = vrot.slane %v3360_v51, %v3324_v1 }
 0xa03   :  { %v2808_v38 = vpop.eup %2807  ;;  %2214 = vst [vmem:[#allocation10 + $0x38] sm:$0xff] %v2206_v23  ;;  %v2241_v32 = vadd.f32 1.0, %v2806_v33  ;;  %v1944_v43 = vpop.f32.mrb[31].mxu0  ;;  %v2526_v50 = vmul.f32 -1.442695, %v1983_v40 }
 0xa04   :  { %v2810_v14 = vpop.eup %2809  ;;  %2811 = vrcp.f32 %v2239_v34  ;;  %v2240_v44 = vadd.f32 1.0, %v2808_v38  ;;  %v1985_v46 = vpop.f32.mrb[27].mxu1 }
 0xa05   :  { %2813 = vrcp.f32 %v2241_v32  ;;  %v2242_v47 = vadd.f32 1.0, %v2810_v14 }
 0xa06   :  { %2815 = vrcp.f32 %v2240_v44 }
 0xa07   :  { %2817 = vrcp.f32 %v2242_v47 }
 0xa08   :  { %2819 = vpow2.f32 %v2523_v45 }
 0xa09   :  { %2821 = vpow2.f32 %v2525_v48 }
 0xa0a   :  { %2823 = vpow2.f32 %v2524_v49 }
 0xa0b   :  { %2825 = vpow2.f32 %v2526_v50 }
 0xa0e   :  { %v2812_v53 = vpop.eup %2811  ;;  %v2021_v58 = vpop.f32.mrb[32].mxu0 }
 0xa0f   :  { %v2814_v55 = vpop.eup %2813  ;;  %2263 = vst [vmem:[#allocation10 + $0x40] sm:$0xff] %v2812_v53  ;;  %v2062_v59 = vpop.f32.mrb[28].mxu1  ;;  %v2022_v4 = vadd.f32 %v2021_v58, %v1123_v52 }
 0xa10   :  { %v2816_v57 = vpop.eup %2815  ;;  %2265 = vst [vmem:[#allocation10 + $0x50] sm:$0xff] %v2814_v55  ;;  %v2023_v63 = vpop.f32.mrb[33].mxu0  ;;  %v2063_v39 = vadd.f32 %v2062_v59, %v1131_v54 }
 0xa11   :  { %v2818_v61 = vpop.eup %2817  ;;  %2264 = vst [vmem:[#allocation10 + $0x48] sm:$0xff] %v2816_v57  ;;  %v2064_v5 = vpop.f32.mrb[29].mxu1  ;;  %v2024_v41 = vadd.f32 %v2023_v63, %v1127_v56  ;;  %v2279_v20 = vmul.f32 0.70710677, %v2022_v4  ;;  %v2271_v43 = vmul.f32 0.5, %v2022_v4 }
 0xa12   :  { %v2820_v6 = vpop.eup %2819  ;;  %2266 = vst [vmem:[#allocation10 + $0x58] sm:$0xff] %v2818_v61  ;;  %v2025_v8 = vpop.f32.mrb[34].mxu0  ;;  %v2065_v18 = vadd.f32 %v2064_v5, %v1135_v60  ;;  %v2281_v0 = vmul.f32 0.70710677, %v2063_v39  ;;  %v2273_v47 = vmul.f32 0.5, %v2063_v39 }
 0xa13   :  { %v2066_v9 = vpop.f32.mrb[30].mxu1  ;;  %v2822_v10 = vpop.eup %2821  ;;  %v2243_v11 = vadd.f32 1.0, %v2820_v6  ;;  %v2280_v24 = vmul.f32 0.70710677, %v2024_v41  ;;  %v2272_v53 = vmul.f32 0.5, %v2024_v41 }
 0xa14   :  { %v2026_v13 = vpop.f32.mrb[35].mxu0  ;;  %v2824_v17 = vpop.eup %2823  ;;  %v2245_v15 = vadd.f32 1.0, %v2822_v10  ;;  %v2282_v22 = vmul.f32 0.70710677, %v2065_v18  ;;  %v2274_v56 = vmul.f32 0.5, %v2065_v18 }
 0xa15   :  { %v2826_v19 = vpop.eup %2825  ;;  %2827 = vrcp.f32 %v2243_v11  ;;  %v2244_v42 = vadd.f32 1.0, %v2824_v17  ;;  %v2067_v21 = vpop.f32.mrb[31].mxu1 }
 0xa16   :  { %2829 = vrcp.f32 %v2245_v15  ;;  %v2246_v7 = vadd.f32 1.0, %v2826_v19 }
 0xa17   :  { %2831 = vrcp.f32 %v2244_v42 }
 0xa18   :  { %2833 = vrcp.f32 %v2246_v7 }
 0xa19   :  { %2835 = verf.f32 %v2279_v20 }
 0xa1a   :  { %2837 = verf.f32 %v2281_v0 }
 0xa1b   :  { %2839 = verf.f32 %v2280_v24 }
 0xa1c   :  { %2841 = verf.f32 %v2282_v22 }
 0xa1e   :  { %v2103_v16 = vpop.f32.mrb[36].mxu0  ;;  %v2144_v29 = vpop.f32.mrb[32].mxu1 }
 0xa1f   :  { %v2828_v28 = vpop.eup %2827  ;;  %v2104_v31 = vadd.f32 %v2103_v16, %v1139_v25  ;;  %v2145_v33 = vadd.f32 %v2144_v29, %v1147_v26  ;;  %v2105_v34 = vpop.f32.mrb[37].mxu0 }
 0xa20   :  { %v2830_v23 = vpop.eup %2829  ;;  %2267 = vst [vmem:[#allocation10 + $0x60] sm:$0xff] %v2828_v28  ;;  %v2146_v62 = vpop.f32.mrb[33].mxu1  ;;  %v2106_v1 = vadd.f32 %v2105_v34, %v1143_v12 }
 0xa21   :  { %v2832_v30 = vpop.eup %2831  ;;  %2269 = vst [vmem:[#allocation10 + $0x70] sm:$0xff] %v2830_v23  ;;  %v2147_v36 = vadd.f32 %v2146_v62, %v1151_v27  ;;  %v2107_v37 = vpop.f32.mrb[38].mxu0  ;;  %v2283_v3 = vmul.f32 0.70710677, %v2104_v31  ;;  %v2285_v32 = vmul.f32 0.70710677, %v2145_v33 }
 0xa22   :  { %v2834_v35 = vpop.eup %2833  ;;  %2268 = vst [vmem:[#allocation10 + $0x68] sm:$0xff] %v2832_v30  ;;  %v2148_v2 = vpop.f32.mrb[34].mxu1  ;;  %v2284_v44 = vmul.f32 0.70710677, %v2106_v1  ;;  %v2275_v4 = vmul.f32 0.5, %v2104_v31  ;;  %v2277_v6 = vmul.f32 0.5, %v2145_v33 }
 0xa23   :  { %v2836_v38 = vpop.eup %2835  ;;  %2270 = vst [vmem:[#allocation10 + $0x78] sm:$0xff] %v2834_v35  ;;  %v2108_v45 = vpop.f32.mrb[39].mxu0  ;;  %2843 = verf.f32 %v2283_v3  ;;  %v2286_v49 = vmul.f32 0.70710677, %v2147_v36  ;;  %v2276_v10 = vmul.f32 0.5, %v2106_v1  ;;  %v2278_v13 = vmul.f32 0.5, %v2147_v36 }
 0xa24   :  { %v2838_v40 = vpop.eup %2837  ;;  %v2295_v14 = vadd.f32 1.0, %v2836_v38  ;;  %v2149_v50 = vpop.f32.mrb[35].mxu1  ;;  %2845 = verf.f32 %v2285_v32 }
 0xa25   :  { %v2840_v46 = vpop.eup %2839  ;;  %v2297_v48 = vadd.f32 1.0, %v2838_v40  ;;  %2847 = verf.f32 %v2284_v44 }
 0xa26   :  { %v2842_v51 = vpop.eup %2841  ;;  %v2303_v52 = vmul.f32 %v2295_v14, %v2271_v43  ;;  %v2296_v54 = vadd.f32 1.0, %v2840_v46  ;;  %2849 = verf.f32 %v2286_v49 }
 0xa27   :  { %v2305_v55 = vmul.f32 %v2297_v48, %v2273_v47  ;;  %v2298_v57 = vadd.f32 1.0, %v2842_v51 }
 0xa28   :  { %2311 = vst [vmem:[#allocation10 + $0x80] sm:$0xff] %v2303_v52  ;;  %v2304_v58 = vmul.f32 %v2296_v54, %v2272_v53 }
 0xa29   :  { %2313 = vst [vmem:[#allocation10 + $0x90] sm:$0xff] %v2305_v55  ;;  %v2306_v59 = vmul.f32 %v2298_v57, %v2274_v56 }
 0xa2a   :  { %2312 = vst [vmem:[#allocation10 + $0x88] sm:$0xff] %v2304_v58 }
 0xa2b   :  { %2314 = vst [vmem:[#allocation10 + $0x98] sm:$0xff] %v2306_v59 }
 0xa2d   :  { %v2844_v60 = vpop.eup %2843 }
 0xa2e   :  { %v2846_v61 = vpop.eup %2845  ;;  %v2299_v63 = vadd.f32 1.0, %v2844_v60 }
 0xa2f   :  { %v2848_v5 = vpop.eup %2847  ;;  %v2301_v39 = vadd.f32 1.0, %v2846_v61 }
 0xa30   :  { %v2850_v8 = vpop.eup %2849  ;;  %v2307_v9 = vmul.f32 %v2299_v63, %v2275_v4  ;;  %v2300_v11 = vadd.f32 1.0, %v2848_v5 }
 0xa31   :  { %v2309_v41 = vmul.f32 %v2301_v39, %v2277_v6  ;;  %v2302_v17 = vadd.f32 1.0, %v2850_v8 }
 0xa32   :  { %2315 = vst [vmem:[#allocation10 + $0xa0] sm:$0xff] %v2307_v9  ;;  %v2308_v15 = vmul.f32 %v2300_v11, %v2276_v10 }
 0xa33   :  { %2317 = vst [vmem:[#allocation10 + $0xb0] sm:$0xff] %v2309_v41  ;;  %v2310_v18 = vmul.f32 %v2302_v17, %v2278_v13 }
 0xa34   :  { %2316 = vst [vmem:[#allocation10 + $0xa8] sm:$0xff] %v2308_v15 }
 0xa35   :  { %2318 = vst [vmem:[#allocation10 + $0xb8] sm:$0xff] %v2310_v18 }
 0xa36   :  { %2950 = shalt.err (!%p2947_p8)
}
 0xa37   :  { %s2951_s24 = scalar_lea.hbm %s3401_s11, 3072 }
 0xa38   :  { %p2952_p9 = scmp.ne.s32.totalorder %s3401_s11, %s2951_s24  ;;  %p2955_p10 = scmp.lt.u32.totalorder %s2951_s24, %s3401_s11 }
 0xa3a   :  { %p2957_p11 = pnand %p2955_p10, %p2952_p9 }
 0xa3c   :  { %2960 = shalt.err (!%p2957_p11)
}
 0xa3d   :  { %2328 = dma.vmem_to_hbm [thread:$0]  %s2326_s22, 3072, %s3401_s11, [#allocation4]  }
 0xa3e   :  { %2967 = dma.done.wait [#allocation4], 3072  }
 0xa3f   :  { %2968 = vsyncadd [#allocation4], 4294964224 }
 0xa40   :  { %2332 = vsyncpa [#allocation3], 1 }
 0xa41   :  { %2333 = vsyncpa [#allocation6], 1 }
 0xa42   :  { %2334 = vsyncpa [#allocation9], 1 }
 0xa43   :  { %2335 = vsyncpa [#allocation4], 1 }

</bundles_post_ra>
